<compile_context>
chip_gen: v7x
topology: tpu7x:2x2x1
jax: 0.10.0
libtpu: 0.0.40
codegen_flags: <defaults>
</compile_context>

<pallas_src>
import jax
import jax.numpy as jnp
from jax.experimental import pallas as pl
from jax.experimental.pallas import tpu as pltpu


def _round_up(x, m):
    return (x + m - 1) // m * m


# ----------------------------------------------------------------------------
# Fused kernel: conv3x3(SAME) + bias + ReLU + global-avg-pool + embed Linear
# ----------------------------------------------------------------------------
def _make_encoder_kernel(H, W, KH, KW, Cin, lpad, inv_hw):
    ph, pw = KH // 2, KW // 2

    def kernel(x_ref, cw_ref, cb_ref, ew_ref, eb_ref, o_ref, xpad_ref):
        # x_ref:    (1, H, W, Cin)          bf16  one image (unpadded)
        # cw_ref:   (KH*KW*Cin, Cf_p)       bf16  im2col-reshaped conv weight
        # cb_ref:   (1, Cf_p)               f32   conv bias
        # ew_ref:   (Cf_p, E_p)             bf16  pre-transposed embed weight (VMEM-resident)
        # eb_ref:   (1, E_p)                f32   embed bias
        # o_ref:    (1, 1, E_p)             f32   embedding for this batch element
        # xpad_ref: (H+KH-1, >=lpad+W+pw, Cin) f32 scratch: halo zeroed in VMEM

        # Zero the halo in VMEM (replaces wrapper-side jnp.pad); the image goes in at an
        # 8-aligned sublane offset so the store is unmasked.
        xpad_ref[...] = jnp.zeros_like(xpad_ref)
        xpad_ref[ph:ph + H, lpad:lpad + W, :] = x_ref[0].astype(jnp.float32)

        # im2col: build one (H*W, KH*KW*Cin) patch slab -> a single MXU matmul.
        cols = []
        for kh in range(KH):
            for kw in range(KW):
                w0 = lpad - pw + kw
                cols.append(xpad_ref[kh:kh + H, w0:w0 + W, :].reshape(H * W, Cin))
        slab = jnp.concatenate(cols, axis=1)                      # (H*W, KH*KW*Cin) f32

        y = jnp.dot(slab.astype(cw_ref.dtype), cw_ref[...],
                    preferred_element_type=jnp.float32)           # (H*W, Cf_p)
        y = jnp.maximum(y + cb_ref[...], 0.0)                     # bias + ReLU (f32 epilogue)
        pooled = jnp.sum(y, axis=0, keepdims=True) * inv_hw       # global avg pool (1, Cf_p)

        # Fused embedding Linear epilogue: pooled @ embed_w.T + b, written lane-dense.
        emb = jnp.dot(pooled.astype(ew_ref.dtype), ew_ref[...],
                      preferred_element_type=jnp.float32) + eb_ref[...]
        o_ref[0] = emb.astype(o_ref.dtype)

    return kernel


# ----------------------------------------------------------------------------
# One-time parameter preparation (reshape / transpose / pad / cast — NOT per forward)
# ----------------------------------------------------------------------------
def prepare_params(params):
    conv_w = params["conv_w"]                      # (KH, KW, Cin, Cf)  HWIO
    conv_b = params["conv_b"].reshape(-1)          # (Cf,)
    embed_w = params["embed_w"]                    # (E, Cf)  PyTorch (out, in)
    embed_b = params["embed_b"].reshape(-1)        # (E,)
    KH, KW, Cin, Cf = conv_w.shape
    E = embed_w.shape[0]
    Cf_p = _round_up(Cf, 128)
    E_p = _round_up(E, 128)

    cw = jnp.pad(conv_w, ((0, 0), (0, 0), (0, 0), (0, Cf_p - Cf)))
    conv_w2d = cw.reshape(KH * KW * Cin, Cf_p).astype(jnp.bfloat16)
    conv_b_p = jnp.pad(conv_b, (0, Cf_p - Cf)).reshape(1, Cf_p).astype(jnp.float32)
    embed_wt = jnp.pad(embed_w.T, ((0, Cf_p - Cf), (0, E_p - E))).astype(jnp.bfloat16)
    embed_b_p = jnp.pad(embed_b, (0, E_p - E)).reshape(1, E_p).astype(jnp.float32)

    return {
        "conv_w2d": conv_w2d, "conv_b": conv_b_p,
        "embed_wt": embed_wt, "embed_b": embed_b_p,
        "meta": {"KH": KH, "KW": KW, "Cin": Cin, "Cf": Cf, "E": E,
                 "Cf_p": Cf_p, "E_p": E_p},
    }


# ----------------------------------------------------------------------------
# EncoderCNN.forward
# ----------------------------------------------------------------------------
def encoder_cnn_forward(images_nchw, prepared):
    m = prepared["meta"]
    B, Cin, H, W = images_nchw.shape
    assert Cin == m["Cin"]
    KH, KW = m["KH"], m["KW"]
    Cf_p, E_p, E = m["Cf_p"], m["E_p"], m["E"]
    K = KH * KW * Cin
    ph, pw = KH // 2, KW // 2
    LPAD = 8                                   # 8-aligned sublane offset for the in-VMEM halo
    assert LPAD >= pw
    Hp = H + KH - 1
    Wscr = _round_up(LPAD + W + (KW - 1 - pw), 8)

    x_nhwc = jnp.transpose(images_nchw, (0, 2, 3, 1)).astype(jnp.bfloat16)  # NCHW -> NHWC, bf16

    out = pl.pallas_call(
        _make_encoder_kernel(H, W, KH, KW, Cin, LPAD, 1.0 / (H * W)),
        out_shape=jax.ShapeDtypeStruct((B, 1, E_p), jnp.float32),
        grid=(B,),
        in_specs=[
            pl.BlockSpec((1, H, W, Cin), lambda b: (b, 0, 0, 0)),
            pl.BlockSpec((K, Cf_p), lambda b: (0, 0)),       # conv weight, resident
            pl.BlockSpec((1, Cf_p), lambda b: (0, 0)),       # conv bias
            pl.BlockSpec((Cf_p, E_p), lambda b: (0, 0)),     # embed weight, resident
            pl.BlockSpec((1, E_p), lambda b: (0, 0)),        # embed bias
        ],
        out_specs=pl.BlockSpec((1, 1, E_p), lambda b: (b, 0, 0)),  # lane-dense (E_p % 128 == 0)
        scratch_shapes=[pltpu.VMEM((Hp, Wscr, Cin), jnp.float32)],
        compiler_params=pltpu.CompilerParams(
            # TODO(synk): for real backbone sizes use a 2-D parallel grid (B, Cf_tiles) so
            # both v7x TensorCores get several steps each.
            dimension_semantics=("parallel",)),
    )(x_nhwc, prepared["conv_w2d"], prepared["conv_b"],
      prepared["embed_wt"], prepared["embed_b"])

    return out.reshape(B, E_p)[:, :E]


# ----------------------------------------------------------------------------
# Pure-JAX f32 reference
# ----------------------------------------------------------------------------
def reference_forward(images_nchw, params):
    x = jnp.transpose(images_nchw, (0, 2, 3, 1))
    y = jax.lax.conv_general_dilated(
        x, params["conv_w"], window_strides=(1, 1), padding="SAME",
        dimension_numbers=("NHWC", "HWIO", "NHWC"))
    y = jnp.maximum(y + params["conv_b"].reshape(1, 1, 1, -1), 0.0)
    feat = jnp.mean(y, axis=(1, 2))
    return feat @ params["embed_w"].T + params["embed_b"].reshape(1, -1)


if __name__ == "__main__":
    B, Cin, H, W = 2, 3, 16, 16      # small NCHW image batch
    Cf = 128                          # stand-in for resnet.fc.in_features (2048)
    E = 64                            # embed_size (padded to 128 lanes inside the kernel)

    key = jax.random.PRNGKey(0)
    k1, k2, k3, k4, kx = jax.random.split(key, 5)
    params = {
        "conv_w": jax.random.normal(k1, (3, 3, Cin, Cf), jnp.float32) * 0.1,
        "conv_b": jax.random.normal(k2, (Cf,), jnp.float32) * 0.1,
        "embed_w": jax.random.normal(k3, (E, Cf), jnp.float32) * 0.05,   # PyTorch (out, in)
        "embed_b": jax.random.normal(k4, (E,), jnp.float32) * 0.05,
    }
    images = jax.random.normal(kx, (B, Cin, H, W), jnp.float32)

    prepared = prepare_params(params)          # one-time weight reshape/transpose/pad/cast
    out = encoder_cnn_forward(images, prepared)
    out = jax.block_until_ready(out)
    assert out.shape == (B, E), out.shape

    ref = jax.block_until_ready(reference_forward(images, params))
    assert jnp.allclose(out, ref, atol=2e-2, rtol=2e-2), \
        float(jnp.max(jnp.abs(out - ref)))

    print("KERNEL_OK")
</pallas_src>

<mosaic_0001>
module attributes {stable_mosaic.version = 11 : i64} {
  func.func @kernel(%arg0: i32, %arg1: memref<1x16x16x3xbf16, #tpu.memory_space<vmem>>, %arg2: memref<27x128xbf16, #tpu.memory_space<vmem>>, %arg3: memref<1x128xf32, #tpu.memory_space<vmem>>, %arg4: memref<128x128xbf16, #tpu.memory_space<vmem>>, %arg5: memref<1x128xf32, #tpu.memory_space<vmem>>, %arg6: memref<1x1x128xf32, #tpu.memory_space<vmem>>, %arg7: memref<18x32x3xf32, #tpu.memory_space<vmem>>) attributes {dimension_semantics = [#tpu.dimension_semantics<parallel>], iteration_bounds = array<i64: 2>, scalar_prefetch = 0 : i64, scratch_operands = 1 : i64, tpu.core_type = #tpu.core_type<tc>, window_params = [{transform_indices = @transform_0, window_bounds = array<i64: 1, 16, 16, 3>}, {pipeline_mode = #tpu.pipeline_mode<synchronous>, transform_indices = @transform_1, window_bounds = array<i64: 27, 128>}, {pipeline_mode = #tpu.pipeline_mode<synchronous>, transform_indices = @transform_2, window_bounds = array<i64: 1, 128>}, {pipeline_mode = #tpu.pipeline_mode<synchronous>, transform_indices = @transform_3, window_bounds = array<i64: 128, 128>}, {pipeline_mode = #tpu.pipeline_mode<synchronous>, transform_indices = @transform_4, window_bounds = array<i64: 1, 128>}, {transform_indices = @transform_5, window_bounds = array<i64: 1, 1, 128>}]} {
    %cst = arith.constant 0.000000e+00 : f32
    %0 = vector.broadcast %cst : f32 to vector<18x32x3xf32>
    %c0 = arith.constant 0 : index
    %c0_0 = arith.constant 0 : index
    %c0_1 = arith.constant 0 : index
    %1 = vector.load %arg7[%c0, %c0_0, %c0_1] : memref<18x32x3xf32, #tpu.memory_space<vmem>>, vector<18x32x3xf32>
    tpu.vector_store %arg7[%c0, %c0_0, %c0_1], %0 {strides = array<i32>} : memref<18x32x3xf32, #tpu.memory_space<vmem>>, vector<18x32x3xf32>,
    %c0_2 = arith.constant 0 : index
    %c0_3 = arith.constant 0 : index
    %c0_4 = arith.constant 0 : index
    %c0_5 = arith.constant 0 : index
    %2 = vector.load %arg1[%c0_2, %c0_3, %c0_4, %c0_5] : memref<1x16x16x3xbf16, #tpu.memory_space<vmem>>, vector<1x16x16x3xbf16>
    %3 = vector.shape_cast %2 : vector<1x16x16x3xbf16> to vector<16x16x3xbf16>
    %4 = arith.extf %3 : vector<16x16x3xbf16> to vector<16x16x3xf32>
    %c1 = arith.constant 1 : index
    %c8 = arith.constant 8 : index
    %c0_6 = arith.constant 0 : index
    %5 = vector.load %arg7[%c1, %c8, %c0_6] : memref<18x32x3xf32, #tpu.memory_space<vmem>>, vector<16x16x3xf32>
    tpu.vector_store %arg7[%c1, %c8, %c0_6], %4 {strides = array<i32>} : memref<18x32x3xf32, #tpu.memory_space<vmem>>, vector<16x16x3xf32>,
    %c0_7 = arith.constant 0 : index
    %c7 = arith.constant 7 : index
    %c0_8 = arith.constant 0 : index
    %6 = vector.load %arg7[%c0_7, %c7, %c0_8] : memref<18x32x3xf32, #tpu.memory_space<vmem>>, vector<16x16x3xf32>
    %7 = vector.shape_cast %6 : vector<16x16x3xf32> to vector<256x3xf32>
    %c0_9 = arith.constant 0 : index
    %c8_10 = arith.constant 8 : index
    %c0_11 = arith.constant 0 : index
    %8 = vector.load %arg7[%c0_9, %c8_10, %c0_11] : memref<18x32x3xf32, #tpu.memory_space<vmem>>, vector<16x16x3xf32>
    %9 = vector.shape_cast %8 : vector<16x16x3xf32> to vector<256x3xf32>
    %c0_12 = arith.constant 0 : index
    %c9 = arith.constant 9 : index
    %c0_13 = arith.constant 0 : index
    %10 = vector.load %arg7[%c0_12, %c9, %c0_13] : memref<18x32x3xf32, #tpu.memory_space<vmem>>, vector<16x16x3xf32>
    %11 = vector.shape_cast %10 : vector<16x16x3xf32> to vector<256x3xf32>
    %c1_14 = arith.constant 1 : index
    %c7_15 = arith.constant 7 : index
    %c0_16 = arith.constant 0 : index
    %12 = vector.load %arg7[%c1_14, %c7_15, %c0_16] : memref<18x32x3xf32, #tpu.memory_space<vmem>>, vector<16x16x3xf32>
    %13 = vector.shape_cast %12 : vector<16x16x3xf32> to vector<256x3xf32>
    %c1_17 = arith.constant 1 : index
    %c8_18 = arith.constant 8 : index
    %c0_19 = arith.constant 0 : index
    %14 = vector.load %arg7[%c1_17, %c8_18, %c0_19] : memref<18x32x3xf32, #tpu.memory_space<vmem>>, vector<16x16x3xf32>
    %15 = vector.shape_cast %14 : vector<16x16x3xf32> to vector<256x3xf32>
    %c1_20 = arith.constant 1 : index
    %c9_21 = arith.constant 9 : index
    %c0_22 = arith.constant 0 : index
    %16 = vector.load %arg7[%c1_20, %c9_21, %c0_22] : memref<18x32x3xf32, #tpu.memory_space<vmem>>, vector<16x16x3xf32>
    %17 = vector.shape_cast %16 : vector<16x16x3xf32> to vector<256x3xf32>
    %c2 = arith.constant 2 : index
    %c7_23 = arith.constant 7 : index
    %c0_24 = arith.constant 0 : index
    %18 = vector.load %arg7[%c2, %c7_23, %c0_24] : memref<18x32x3xf32, #tpu.memory_space<vmem>>, vector<16x16x3xf32>
    %19 = vector.shape_cast %18 : vector<16x16x3xf32> to vector<256x3xf32>
    %c2_25 = arith.constant 2 : index
    %c8_26 = arith.constant 8 : index
    %c0_27 = arith.constant 0 : index
    %20 = vector.load %arg7[%c2_25, %c8_26, %c0_27] : memref<18x32x3xf32, #tpu.memory_space<vmem>>, vector<16x16x3xf32>
    %21 = vector.shape_cast %20 : vector<16x16x3xf32> to vector<256x3xf32>
    %c2_28 = arith.constant 2 : index
    %c9_29 = arith.constant 9 : index
    %c0_30 = arith.constant 0 : index
    %22 = vector.load %arg7[%c2_28, %c9_29, %c0_30] : memref<18x32x3xf32, #tpu.memory_space<vmem>>, vector<16x16x3xf32>
    %23 = vector.shape_cast %22 : vector<16x16x3xf32> to vector<256x3xf32>
    %24 = tpu.concatenate %7, %9, %11, %13, %15, %17, %19, %21, %23 in 1 : vector<256x3xf32>, vector<256x3xf32>, vector<256x3xf32>, vector<256x3xf32>, vector<256x3xf32>, vector<256x3xf32>, vector<256x3xf32>, vector<256x3xf32>, vector<256x3xf32> -> vector<256x27xf32>
    %25 = arith.truncf %24 : vector<256x27xf32> to vector<256x27xbf16>
    %c0_31 = arith.constant 0 : index
    %c0_32 = arith.constant 0 : index
    %26 = vector.load %arg2[%c0_31, %c0_32] : memref<27x128xbf16, #tpu.memory_space<vmem>>, vector<27x128xbf16>
    %cst_33 = arith.constant dense<0.000000e+00> : vector<256x128xf32>
    %27 = tpu.matmul %25, %26, %cst_33 {dimension_numbers = #tpu.dot_dimension_numbers<[1], [0], [0], [1], [0, 0, 1, 1], [], []>} : vector<256x27xbf16>, vector<27x128xbf16>, vector<256x128xf32> -> vector<256x128xf32>
    %c0_34 = arith.constant 0 : index
    %c0_35 = arith.constant 0 : index
    %28 = vector.load %arg3[%c0_34, %c0_35] : memref<1x128xf32, #tpu.memory_space<vmem>>, vector<1x128xf32>
    %29 = vector.broadcast %28 : vector<1x128xf32> to vector<256x128xf32>
    %30 = arith.addf %27, %29 : vector<256x128xf32>
    %cst_36 = arith.constant 0.000000e+00 : f32
    %31 = vector.broadcast %cst_36 : f32 to vector<256x128xf32>
    %32 = arith.maximumf %30, %31 : vector<256x128xf32>
    %cst_37 = arith.constant dense<0.000000e+00> : vector<128xf32>
    %33 = vector.multi_reduction <add>, %32, %cst_37 [0] : vector<256x128xf32> to vector<128xf32>
    %34 = vector.shape_cast %33 : vector<128xf32> to vector<1x128xf32>
    %cst_38 = arith.constant 3.906250e-03 : f32
    %35 = vector.broadcast %cst_38 : f32 to vector<1x128xf32>
    %36 = arith.mulf %34, %35 : vector<1x128xf32>
    %37 = arith.truncf %36 : vector<1x128xf32> to vector<1x128xbf16>
    %c0_39 = arith.constant 0 : index
    %c0_40 = arith.constant 0 : index
    %38 = vector.load %arg4[%c0_39, %c0_40] : memref<128x128xbf16, #tpu.memory_space<vmem>>, vector<128x128xbf16>
    %cst_41 = arith.constant dense<0.000000e+00> : vector<1x128xf32>
    %39 = tpu.matmul %37, %38, %cst_41 {dimension_numbers = #tpu.dot_dimension_numbers<[1], [0], [0], [1], [0, 0, 1, 1], [], []>} : vector<1x128xbf16>, vector<128x128xbf16>, vector<1x128xf32> -> vector<1x128xf32>
    %c0_42 = arith.constant 0 : index
    %c0_43 = arith.constant 0 : index
    %40 = vector.load %arg5[%c0_42, %c0_43] : memref<1x128xf32, #tpu.memory_space<vmem>>, vector<1x128xf32>
    %41 = arith.addf %39, %40 : vector<1x128xf32>
    %c0_44 = arith.constant 0 : index
    %c0_45 = arith.constant 0 : index
    %c0_46 = arith.constant 0 : index
    %42 = vector.load %arg6[%c0_44, %c0_45, %c0_46] : memref<1x1x128xf32, #tpu.memory_space<vmem>>, vector<1x1x128xf32>
    %43 = vector.shape_cast %42 : vector<1x1x128xf32> to vector<1x128xf32>
    %44 = vector.shape_cast %41 : vector<1x128xf32> to vector<1x1x128xf32>
    tpu.vector_store %arg6[%c0_44, %c0_45, %c0_46], %44 {strides = array<i32>} : memref<1x1x128xf32, #tpu.memory_space<vmem>>, vector<1x1x128xf32>,
    return
  }
  func.func @transform_0(%arg0: i32) -> (i32, i32, i32, i32) {
    %c0_i32 = arith.constant 0 : i32
    %c0_i32_0 = arith.constant 0 : i32
    %c0_i32_1 = arith.constant 0 : i32
    %c0_i32_2 = arith.constant 0 : i32
    return %arg0, %c0_i32, %c0_i32_0, %c0_i32_1 : i32, i32, i32, i32
  }
  func.func @transform_1(%arg0: i32) -> (i32, i32) {
    %c0_i32 = arith.constant 0 : i32
    %c0_i32_0 = arith.constant 0 : i32
    %c0_i32_1 = arith.constant 0 : i32
    return %c0_i32, %c0_i32_0 : i32, i32
  }
  func.func @transform_2(%arg0: i32) -> (i32, i32) {
    %c0_i32 = arith.constant 0 : i32
    %c0_i32_0 = arith.constant 0 : i32
    %c0_i32_1 = arith.constant 0 : i32
    return %c0_i32, %c0_i32_0 : i32, i32
  }
  func.func @transform_3(%arg0: i32) -> (i32, i32) {
    %c0_i32 = arith.constant 0 : i32
    %c0_i32_0 = arith.constant 0 : i32
    %c0_i32_1 = arith.constant 0 : i32
    return %c0_i32, %c0_i32_0 : i32, i32
  }
  func.func @transform_4(%arg0: i32) -> (i32, i32) {
    %c0_i32 = arith.constant 0 : i32
    %c0_i32_0 = arith.constant 0 : i32
    %c0_i32_1 = arith.constant 0 : i32
    return %c0_i32, %c0_i32_0 : i32, i32
  }
  func.func @transform_5(%arg0: i32) -> (i32, i32, i32) {
    %c0_i32 = arith.constant 0 : i32
    %c0_i32_0 = arith.constant 0 : i32
    %c0_i32_1 = arith.constant 0 : i32
    return %arg0, %c0_i32, %c0_i32_0 : i32, i32, i32
  }
}

</mosaic_0001>

<bundles_post_ra>
// kernel: tpu_custom_call.1
= control target key start
LH: loop header
LB: loop body
LE: loop exit
PB: predicated region body
PF: predicated region fallthrough
CT: control target
= control target key end

     0   :  { %10 = vsyncpa [#allocation4], 0  ;;  %s4581_s0 = inlined_call_operand.vmem [shape: bf16[2,16,16,3], index: 0, kind: input, shape index: {}]   ;;  %s4582_s1 = inlined_call_operand.vmem [shape: bf16[27,128], index: 1, kind: input, shape index: {}]   ;;  %s4583_s2 = inlined_call_operand.vmem [shape: f32[1,128], index: 2, kind: input, shape index: {}]   ;;  %s4584_s3 = inlined_call_operand.vmem [shape: bf16[128,128], index: 3, kind: input, shape index: {}]   ;;  %s4585_s4 = inlined_call_operand.vmem [shape: f32[1,128], index: 4, kind: input, shape index: {}]   ;;  %s4586_s5 = inlined_call_operand.hbm [shape: f32[2,1,128], index: 5, kind: output, shape index: {}]  }
   0x1   :  { %12 = vsyncpa [#allocation4 + $0x1], 0  ;;  %s3477_s18 = smov 0   ;;  %s3479_s19 = smov 0  }
   0x2   :  { %s3481_s20 = smov 0   ;;  %s3483_s21 = smov 0  }
   0x3 LB: > { %s3498_s22 = sadd.s32 4294967295, %s3433_s21   ;;  %s2469_s23 = sadd.s32 4294967294, %s3433_s21   ;;  %s3433_s21 = sphi %s3483_s21, %s4592_s21   ;;  %s3429_s20 = sphi %s3481_s20, %s4591_s20   ;;  %s3425_s19 = sphi %s3479_s19, %s4590_s19   ;;  %s3421_s18 = sphi %s3477_s18, %s4589_s18  }
   0x4   : > { %s3502_s24 = sadd.s32 1, %s3433_s21   ;;  %s135_s25 = sadd.s32 1, %s3429_s20 }
   0x5   : > { %s132_s26 = ssub.s32 %s3433_s21, %s3502_s24  ;;  %p145_p0 = scmp.ne.s32.totalorder %s3429_s20, %s3425_s19 }
   0x6   : > { %p133_p1 = scmp.eq.s32.totalorder %s132_s26, 0  ;;  %p146_p2 = scmp.eq.s32.totalorder %s3498_s22, 1 }
   0x7   : > { %p151_p3 = scmp.ne.s32.totalorder %s3425_s19, %s3421_s18  ;;  %p152_p4 = scmp.eq.s32.totalorder %s2469_s23, 1 }
   0x8   : > { %s3513_s27 = scalar_select %p133_p1, %s3429_s20, %s135_s25  }
   0x9   : > { %p3515_p5 = por %p146_p2, %p145_p0  ;;  %p3519_p6 = por %p152_p4, %p151_p3 }
   0xa   : > { %p2472_p7 = scmp.ge.s32.totalorder %s3433_s21, 1  ;;  %p190_p8 = scmp.lt.s32.totalorder %s3433_s21, 3 }
   0xc   : > { %p191_p9 = pnand %p2472_p7, %p190_p8 }
   0xd   : > { %vm223_vm0 = vcmask (!%p191_p9), 23552   ;;  %v3435_v0 = vmov (!%p191_p9), 0.0   ;;  %p217_p10 = scmp.lt.s32.totalorder (!%p191_p9), %s3498_s22, 1  ;;  %s3436_s10 = smov (!%p191_p9), 6   ;;  %vm2056_vm1 = vcmask (!%p191_p9), 1044480   ;;  %vm2057_vm2 = vcmask (!%p191_p9), 1045504  }
   0xe   : > { %194 = sbr.rel (%p191_p9) target bundleno = 899 (0x383), region = 40  ;;  %225 = vst.msk [vmem:[#allocation2 + $0x8] sm:$0xff] (!%p191_p9), %vm223_vm0, %v3435_v0  ;;  %226 = vst.msk [vmem:[#allocation2 + $0x10] sm:$0xff] (!%p191_p9), %vm223_vm0, %v3435_v0  ;;  %2648 = vmatprep.subr.bf16.mxu1 (!%p191_p9), %v3435_v0  ;;  %s3437_s11 = smov (!%p191_p9), 3   ;;  %v3441_v60 = vmov (!%p191_p9), 65535   ;;  %v3358_v63 = vld [vmem:[%s4582_s1] sm:$0xff] (!%p191_p9)  }
   0xf   : > { %227 = vst.msk [vmem:[#allocation2 + $0x18] sm:$0xff] (!%p191_p9), %vm223_vm0, %v3435_v0  ;;  %224 = vst.msk [vmem:[#allocation2] sm:$0xff] (!%p191_p9), %vm223_vm0, %v3435_v0  ;;  %s3438_s12 = smov (!%p191_p9), 9   ;;  %s3439_s13 = smov (!%p191_p9), 12   ;;  %v2058_v61 = vsel (!%p191_p9), %vm2056_vm1, 4294967295, %v3441_v60  ;;  %2612 = vmatprep.subr.bf16.mxu0 (!%p191_p9), %v3358_v63  ;;  %vm1738_vm3 = vcmask (!%p191_p9), 48128  }
  0x10   : > { %228 = vst.msk [vmem:[#allocation2 + $0x20] sm:$0xff] (!%p191_p9), %vm223_vm0, %v3435_v0  ;;  %229 = vst.msk [vmem:[#allocation2 + $0x28] sm:$0xff] (!%p191_p9), %vm223_vm0, %v3435_v0  ;;  %s3440_s14 = smov (!%p191_p9), 15   ;;  %s3442_s15 = smov (!%p191_p9), 18   ;;  %2613 = vmatpush3.bf16.msra.mxu0 (!%p191_p9), %v3358_v63  ;;  %vm1771_vm4 = vcmask (!%p191_p9), 72704   ;;  %vm1804_vm5 = vcmask (!%p191_p9), 97280  }
  0x11   : > { %230 = vst.msk [vmem:[#allocation2 + $0x30] sm:$0xff] (!%p191_p9), %vm223_vm0, %v3435_v0  ;;  %231 = vst.msk [vmem:[#allocation2 + $0x38] sm:$0xff] (!%p191_p9), %vm223_vm0, %v3435_v0  ;;  %s3443_s26 = smov (!%p191_p9), 21   ;;  %vm1837_vm6 = vcmask (!%p191_p9), 121856   ;;  %vm1870_vm7 = vcmask (!%p191_p9), 146432   ;;  %vm1903_vm8 = vcmask (!%p191_p9), 171008  }
  0x12   : > { %232 = vst.msk [vmem:[#allocation2 + $0x40] sm:$0xff] (!%p191_p9), %vm223_vm0, %v3435_v0  ;;  %233 = vst.msk [vmem:[#allocation2 + $0x48] sm:$0xff] (!%p191_p9), %vm223_vm0, %v3435_v0  ;;  %vm1936_vm9 = vcmask (!%p191_p9), 195584   ;;  %vm2007_vm10 = vcmask (!%p191_p9), 220160   ;;  %vm3445_vm11 = vmmov (!%p191_p9), 0   ;;  %s215_s8 = sand.u32 (!%p191_p9), 1, %s3425_s19  }
  0x13   : > { %234 = vst.msk [vmem:[#allocation2 + $0x50] sm:$0xff] (!%p191_p9), %vm223_vm0, %v3435_v0  ;;  %235 = vst.msk [vmem:[#allocation2 + $0x58] sm:$0xff] (!%p191_p9), %vm223_vm0, %v3435_v0  ;;  %2664 = vmatprep.mubr.msk.bf16.mxu1 (!%p191_p9), %vm3445_vm11, %v3435_v0  ;;  %s2402_s17 = scalar_lea.sflag (!%p191_p9), [#allocation4], %s215_s8  ;;  %s3446_s23 = smov (!%p191_p9), [#allocation3]  }
  0x14   : > { %236 = vst.msk [vmem:[#allocation2 + $0x60] sm:$0xff] (!%p191_p9), %vm223_vm0, %v3435_v0  ;;  %237 = vst.msk [vmem:[#allocation2 + $0x68] sm:$0xff] (!%p191_p9), %vm223_vm0, %v3435_v0  ;;  %s3375_s25 = sshll.u32 (!%p191_p9), %s3446_s23, 4  ;;  %s3376_s25 = int_to_ptr.vmem [resolvable:$false] %s3375_s25 }
  0x15   : > { %238 = vst.msk [vmem:[#allocation2 + $0x70] sm:$0xff] %vm223_vm0, %v3435_v0  ;;  %239 = vst.msk [vmem:[#allocation2 + $0x78] sm:$0xff] %vm223_vm0, %v3435_v0  ;;  %s218_s30 = scalar_select %p217_p10, %s3498_s22, 1  ;;  %v457_v4 = vld [vmem:[#allocation2 + $0x9] sm:$0xff] }
  0x16   : > { %240 = vst.msk [vmem:[#allocation2 + $0x80] sm:$0xff] %vm223_vm0, %v3435_v0  ;;  %241 = vst.msk [vmem:[#allocation2 + $0x88] sm:$0xff] %vm223_vm0, %v3435_v0  ;;  %v458_v5 = vld [vmem:[#allocation2 + $0x11] sm:$0xff]  ;;  %v425_v6 = vld [vmem:[#allocation2 + $0x8] sm:$0xff] }
  0x17   : > { %242 = vst.msk [vmem:[#allocation2 + $0x90] sm:$0xff] %vm223_vm0, %v3435_v0  ;;  %243 = vst.msk [vmem:[#allocation2 + $0x98] sm:$0xff] %vm223_vm0, %v3435_v0  ;;  %s2505_s6 = sshll.u32 %s218_s30, 7  ;;  %v2723_v11 = vpack.i.bf16 %v458_v5, %v457_v4  ;;  %v426_v12 = vld [vmem:[#allocation2 + $0x10] sm:$0xff]  ;;  %s3444_s30 = smov 24  }
  0x18   : > { %244 = vst.msk [vmem:[#allocation2 + $0xa0] sm:$0xff] %vm223_vm0, %v3435_v0  ;;  %245 = vst.msk [vmem:[#allocation2 + $0xa8] sm:$0xff] %vm223_vm0, %v3435_v0  ;;  %s3675_s9 = scalar_lea.vmem %s4581_s0, %s2505_s6  ;;  %v2718_v17 = vpack.i.bf16 %v426_v12, %v425_v6 }
  0x19   : > { %246 = vst.msk [vmem:[#allocation2 + $0xb0] sm:$0xff] %vm223_vm0, %v3435_v0  ;;  %247 = vst.msk [vmem:[#allocation2 + $0xb8] sm:$0xff] %vm223_vm0, %v3435_v0  ;;  %v2507_v1 = vld [vmem:[%s3675_s9] sm:$0xff]   ;;  %v2570_v2 = vld [vmem:[%s3675_s9 + $0x8] sm:$0xff]   ;;  %2724 = vrot.lane.b32.xlu1 %v2723_v11, %s3436_s10 }
  0x1a   : > { %248 = vst.msk [vmem:[#allocation2 + $0xc0] sm:$0xff] %vm223_vm0, %v3435_v0  ;;  %249 = vst.msk [vmem:[#allocation2 + $0xc8] sm:$0xff] %vm223_vm0, %v3435_v0  ;;  %v2571_v3 = vld [vmem:[%s3675_s9 + $0x10] sm:$0xff]   ;;  %v2508_v7 = vunpack.c.l.bf16 %v2507_v1  ;;  %v2509_v8 = vunpack.c.h.bf16 %v2507_v1  ;;  %v2512_v9 = vunpack.c.l.bf16 %v2570_v2  ;;  %v2513_v10 = vunpack.c.h.bf16 %v2570_v2  ;;  %v2572_v15 = vld [vmem:[%s3675_s9 + $0x18] sm:$0xff]   ;;  %2719 = vrot.lane.b32.xlu0 %v2718_v17, %s3437_s11 }
  0x1b   : > { %250 = vst.msk [vmem:[#allocation2 + $0xd0] sm:$0xff] %vm223_vm0, %v3435_v0  ;;  %251 = vst.msk [vmem:[#allocation2 + $0xd8] sm:$0xff] %vm223_vm0, %v3435_v0  ;;  %v2516_v13 = vunpack.c.l.bf16 %v2571_v3  ;;  %v2517_v14 = vunpack.c.h.bf16 %v2571_v3  ;;  %v2573_v16 = vld [vmem:[%s3675_s9 + $0x20] sm:$0xff]   ;;  %v2520_v18 = vunpack.c.l.bf16 %v2572_v15  ;;  %v2521_v19 = vunpack.c.h.bf16 %v2572_v15  ;;  %v2574_v21 = vld [vmem:[%s3675_s9 + $0x28] sm:$0xff]  }
  0x1c   : > { %252 = vst.msk [vmem:[#allocation2 + $0xe0] sm:$0xff] %vm223_vm0, %v3435_v0  ;;  %253 = vst.msk [vmem:[#allocation2 + $0xe8] sm:$0xff] %vm223_vm0, %v3435_v0  ;;  %v2524_v20 = vunpack.c.l.bf16 %v2573_v16  ;;  %v2575_v22 = vld [vmem:[%s3675_s9 + $0x30] sm:$0xff]   ;;  %v2576_v23 = vld [vmem:[%s3675_s9 + $0x38] sm:$0xff]   ;;  %v2525_v24 = vunpack.c.h.bf16 %v2573_v16  ;;  %v2528_v25 = vunpack.c.l.bf16 %v2574_v21  ;;  %v2529_v26 = vunpack.c.h.bf16 %v2574_v21 }
  0x1d   : > { %254 = vst.msk [vmem:[#allocation2 + $0xf0] sm:$0xff] %vm223_vm0, %v3435_v0  ;;  %255 = vst.msk [vmem:[#allocation2 + $0xf8] sm:$0xff] %vm223_vm0, %v3435_v0  ;;  %v2532_v27 = vunpack.c.l.bf16 %v2575_v22  ;;  %v2577_v28 = vld [vmem:[%s3675_s9 + $0x40] sm:$0xff]   ;;  %v2533_v29 = vunpack.c.h.bf16 %v2575_v22  ;;  %v2536_v30 = vunpack.c.l.bf16 %v2576_v23  ;;  %v2537_v31 = vunpack.c.h.bf16 %v2576_v23  ;;  %v2578_v33 = vld [vmem:[%s3675_s9 + $0x48] sm:$0xff]  }
  0x1e   : > { %256 = vst.msk [vmem:[#allocation2 + $0x100] sm:$0xff] %vm223_vm0, %v3435_v0  ;;  %257 = vst.msk [vmem:[#allocation2 + $0x108] sm:$0xff] %vm223_vm0, %v3435_v0  ;;  %v2540_v32 = vunpack.c.l.bf16 %v2577_v28  ;;  %v2541_v34 = vunpack.c.h.bf16 %v2577_v28  ;;  %v2544_v35 = vunpack.c.l.bf16 %v2578_v33  ;;  %v2545_v36 = vunpack.c.h.bf16 %v2578_v33  ;;  %v3359_v2 = vld [vmem:[%s4582_s1 + $0x8] sm:$0x3f]   ;;  %v2579_v3 = vld [vmem:[%s3675_s9 + $0x50] sm:$0xff]  }
  0x1f   : > { %258 = vst.msk [vmem:[#allocation2 + $0x110] sm:$0xff] %vm223_vm0, %v3435_v0  ;;  %259 = vst.msk [vmem:[#allocation2 + $0x118] sm:$0xff] %vm223_vm0, %v3435_v0  ;;  %v2059_v1 = vsel %vm2057_vm2, %v2058_v61, 0  ;;  %v2548_v4 = vunpack.c.l.bf16 %v2579_v3  ;;  %v2549_v5 = vunpack.c.h.bf16 %v2579_v3  ;;  %v2582_v33 = vld [vmem:[%s3675_s9 + $0x68] sm:$0xff]   ;;  %v2584_v63 = vld [vmem:[%s3675_s9 + $0x78] sm:$0xff]  }
  0x20   : > { %260 = vst.msk [vmem:[#allocation2 + $0x120] sm:$0xff] %vm223_vm0, %v3435_v0  ;;  %261 = vst.msk [vmem:[#allocation2 + $0x128] sm:$0xff] %vm223_vm0, %v3435_v0  ;;  %v2061_v6 = vand.u32 %v3359_v2, %v2059_v1  ;;  %v2568_v2 = vunpack.c.l.bf16 %v2584_v63  ;;  %v2569_v3 = vunpack.c.h.bf16 %v2584_v63 }
  0x21   : > { %262 = vst.msk [vmem:[#allocation2 + $0x130] sm:$0xff] %vm223_vm0, %v3435_v0  ;;  %263 = vst.msk [vmem:[#allocation2 + $0x138] sm:$0xff] %vm223_vm0, %v3435_v0 }
  0x22   : > { %264 = vst.msk [vmem:[#allocation2 + $0x140] sm:$0xff] %vm223_vm0, %v3435_v0  ;;  %265 = vst.msk [vmem:[#allocation2 + $0x148] sm:$0xff] %vm223_vm0, %v3435_v0  ;;  %2614 = vmatprep.subr.bf16.mxu0 %v2061_v6 }
  0x23   : > { %266 = vst.msk [vmem:[#allocation2 + $0x150] sm:$0xff] %vm223_vm0, %v3435_v0  ;;  %267 = vst.msk [vmem:[#allocation2 + $0x158] sm:$0xff] %vm223_vm0, %v3435_v0  ;;  %2615 = vmatpush3.bf16.msra.mxu0 %v2061_v6 }
  0x24   : > { %268 = vst.msk [vmem:[#allocation2 + $0x160] sm:$0xff] %vm223_vm0, %v3435_v0  ;;  %269 = vst.msk [vmem:[#allocation2 + $0x168] sm:$0xff] %vm223_vm0, %v3435_v0 }
  0x25   : > { %270 = vst.msk [vmem:[#allocation2 + $0x170] sm:$0xff] %vm223_vm0, %v3435_v0  ;;  %271 = vst.msk [vmem:[#allocation2 + $0x178] sm:$0xff] %vm223_vm0, %v3435_v0 }
  0x26   : > { %272 = vst.msk [vmem:[#allocation2 + $0x180] sm:$0xff] %vm223_vm0, %v3435_v0  ;;  %273 = vst.msk [vmem:[#allocation2 + $0x188] sm:$0xff] %vm223_vm0, %v3435_v0 }
  0x27   : > { %274 = vst.msk [vmem:[#allocation2 + $0x190] sm:$0xff] %vm223_vm0, %v3435_v0  ;;  %275 = vst.msk [vmem:[#allocation2 + $0x198] sm:$0xff] %vm223_vm0, %v3435_v0 }
  0x28   : > { %276 = vst.msk [vmem:[#allocation2 + $0x1a0] sm:$0xff] %vm223_vm0, %v3435_v0  ;;  %277 = vst.msk [vmem:[#allocation2 + $0x1a8] sm:$0xff] %vm223_vm0, %v3435_v0 }
  0x29   : > { %278 = vst.msk [vmem:[#allocation2 + $0x1b0] sm:$0xff] %vm223_vm0, %v3435_v0  ;;  %279 = vst.msk [vmem:[#allocation2 + $0x1b8] sm:$0xff] %vm223_vm0, %v3435_v0 }
  0x2a   : > { %280 = vst.msk [vmem:[#allocation2 + $0x1c0] sm:$0xff] %vm223_vm0, %v3435_v0  ;;  %281 = vst.msk [vmem:[#allocation2 + $0x1c8] sm:$0xff] %vm223_vm0, %v3435_v0 }
  0x2b   : > { %282 = vst.msk [vmem:[#allocation2 + $0x1d0] sm:$0xff] %vm223_vm0, %v3435_v0  ;;  %283 = vst.msk [vmem:[#allocation2 + $0x1d8] sm:$0xff] %vm223_vm0, %v3435_v0 }
  0x2c   : > { %284 = vst.msk [vmem:[#allocation2 + $0x1e0] sm:$0xff] %vm223_vm0, %v3435_v0  ;;  %285 = vst.msk [vmem:[#allocation2 + $0x1e8] sm:$0xff] %vm223_vm0, %v3435_v0 }
  0x2d   : > { %286 = vst.msk [vmem:[#allocation2 + $0x1f0] sm:$0xff] %vm223_vm0, %v3435_v0  ;;  %287 = vst.msk [vmem:[#allocation2 + $0x1f8] sm:$0xff] %vm223_vm0, %v3435_v0 }
  0x2e   : > { %288 = vst.msk [vmem:[#allocation2 + $0x200] sm:$0xff] %vm223_vm0, %v3435_v0  ;;  %289 = vst.msk [vmem:[#allocation2 + $0x208] sm:$0xff] %vm223_vm0, %v3435_v0 }
  0x2f   : > { %290 = vst.msk [vmem:[#allocation2 + $0x210] sm:$0xff] %vm223_vm0, %v3435_v0  ;;  %291 = vst.msk [vmem:[#allocation2 + $0x218] sm:$0xff] %vm223_vm0, %v3435_v0 }
  0x30   : > { %292 = vst.msk [vmem:[#allocation2 + $0x220] sm:$0xff] %vm223_vm0, %v3435_v0  ;;  %293 = vst.msk [vmem:[#allocation2 + $0x228] sm:$0xff] %vm223_vm0, %v3435_v0 }
  0x31   : > { %294 = vst.msk [vmem:[#allocation2 + $0x230] sm:$0xff] %vm223_vm0, %v3435_v0  ;;  %295 = vst.msk [vmem:[#allocation2 + $0x238] sm:$0xff] %vm223_vm0, %v3435_v0 }
  0x32   : > { %361 = vst.msk [vmem:[#allocation2 + $0x28] sm:$0xff] %vm223_vm0, %v2508_v7  ;;  %362 = vst.msk [vmem:[#allocation2 + $0x30] sm:$0xff] %vm223_vm0, %v2509_v8 }
  0x33   : > { %363 = vst.msk [vmem:[#allocation2 + $0x48] sm:$0xff] %vm223_vm0, %v2512_v9  ;;  %364 = vst.msk [vmem:[#allocation2 + $0x50] sm:$0xff] %vm223_vm0, %v2513_v10  ;;  %v2580_v9 = vld [vmem:[%s3675_s9 + $0x58] sm:$0xff]  }
  0x34   : > { %365 = vst.msk [vmem:[#allocation2 + $0x68] sm:$0xff] %vm223_vm0, %v2516_v13  ;;  %366 = vst.msk [vmem:[#allocation2 + $0x70] sm:$0xff] %vm223_vm0, %v2517_v14  ;;  %v2552_v11 = vunpack.c.l.bf16 %v2580_v9  ;;  %v2553_v12 = vunpack.c.h.bf16 %v2580_v9 }
  0x35   : > { %367 = vst.msk [vmem:[#allocation2 + $0x88] sm:$0xff] %vm223_vm0, %v2520_v18  ;;  %368 = vst.msk [vmem:[#allocation2 + $0x90] sm:$0xff] %vm223_vm0, %v2521_v19  ;;  %v2581_v19 = vld [vmem:[%s3675_s9 + $0x60] sm:$0xff]  }
  0x36   : > { %369 = vst.msk [vmem:[#allocation2 + $0xa8] sm:$0xff] %vm223_vm0, %v2524_v20  ;;  %370 = vst.msk [vmem:[#allocation2 + $0xb0] sm:$0xff] %vm223_vm0, %v2525_v24  ;;  %v2556_v22 = vunpack.c.l.bf16 %v2581_v19  ;;  %v2557_v23 = vunpack.c.h.bf16 %v2581_v19 }
  0x37   : > { %371 = vst.msk [vmem:[#allocation2 + $0xc8] sm:$0xff] %vm223_vm0, %v2528_v25  ;;  %372 = vst.msk [vmem:[#allocation2 + $0xd0] sm:$0xff] %vm223_vm0, %v2529_v26 }
  0x38   : > { %373 = vst.msk [vmem:[#allocation2 + $0xe8] sm:$0xff] %vm223_vm0, %v2532_v27  ;;  %374 = vst.msk [vmem:[#allocation2 + $0xf0] sm:$0xff] %vm223_vm0, %v2533_v29 }
  0x39   : > { %375 = vst.msk [vmem:[#allocation2 + $0x108] sm:$0xff] %vm223_vm0, %v2536_v30  ;;  %376 = vst.msk [vmem:[#allocation2 + $0x110] sm:$0xff] %vm223_vm0, %v2537_v31  ;;  %v459_v37 = vld [vmem:[#allocation2 + $0x29] sm:$0xff]  ;;  %v460_v38 = vld [vmem:[#allocation2 + $0x31] sm:$0xff] }
  0x3a   : > { %377 = vst.msk [vmem:[#allocation2 + $0x128] sm:$0xff] %vm223_vm0, %v2540_v32  ;;  %378 = vst.msk [vmem:[#allocation2 + $0x130] sm:$0xff] %vm223_vm0, %v2541_v34  ;;  %v427_v39 = vld [vmem:[#allocation2 + $0x28] sm:$0xff]  ;;  %v2733_v40 = vpack.i.bf16 %v460_v38, %v459_v37  ;;  %v428_v41 = vld [vmem:[#allocation2 + $0x30] sm:$0xff] }
  0x3b   : > { %379 = vst.msk [vmem:[#allocation2 + $0x148] sm:$0xff] %vm223_vm0, %v2544_v35  ;;  %380 = vst.msk [vmem:[#allocation2 + $0x150] sm:$0xff] %vm223_vm0, %v2545_v36  ;;  %v3709_v42 = vld [vmem:[#allocation2 + $0x47] sm:$0xff]  ;;  %v3711_v43 = vld [vmem:[#allocation2 + $0x4f] sm:$0xff]  ;;  %v2728_v44 = vpack.i.bf16 %v428_v41, %v427_v39  ;;  %v2560_v35 = vunpack.c.l.bf16 %v2582_v33  ;;  %v2561_v36 = vunpack.c.h.bf16 %v2582_v33 }
  0x3c   : > { %v3713_v45 = vld [vmem:[#allocation2 + $0x27] sm:$0xff]  ;;  %v3715_v46 = vld [vmem:[#allocation2 + $0x2f] sm:$0xff]  ;;  %2734 = vrot.lane.b32.xlu1 %v2733_v40, %s3436_s10  ;;  %v2743_v47 = vpack.i.bf16 %v3711_v43, %v3709_v42  ;;  %381 = vst.msk [vmem:[#allocation2 + $0x168] sm:$0xff] %vm223_vm0, %v2548_v4  ;;  %382 = vst.msk [vmem:[#allocation2 + $0x170] sm:$0xff] %vm223_vm0, %v2549_v5 }
  0x3d   : > { %2729 = vrot.lane.b32.xlu0 %v2728_v44, %s3437_s11  ;;  %v2738_v48 = vpack.i.bf16 %v3715_v46, %v3713_v45  ;;  %v523_v49 = vld [vmem:[#allocation2 + $0x48] sm:$0xff]  ;;  %v524_v50 = vld [vmem:[#allocation2 + $0x50] sm:$0xff]  ;;  %383 = vst.msk [vmem:[#allocation2 + $0x188] sm:$0xff] %vm223_vm0, %v2552_v11  ;;  %384 = vst.msk [vmem:[#allocation2 + $0x190] sm:$0xff] %vm223_vm0, %v2553_v12 }
  0x3e   : > { %v2753_v51 = vpack.i.bf16 %v524_v50, %v523_v49  ;;  %v555_v52 = vld [vmem:[#allocation2 + $0x49] sm:$0xff]  ;;  %v556_v53 = vld [vmem:[#allocation2 + $0x51] sm:$0xff]  ;;  %385 = vst.msk [vmem:[#allocation2 + $0x1a8] sm:$0xff] %vm223_vm0, %v2556_v22  ;;  %386 = vst.msk [vmem:[#allocation2 + $0x1b0] sm:$0xff] %vm223_vm0, %v2557_v23 }
  0x3f   : > { %v2763_v54 = vpack.i.bf16 %v556_v53, %v555_v52  ;;  %v3727_v55 = vld [vmem:[#allocation2 + $0x67] sm:$0xff]  ;;  %v3729_v56 = vld [vmem:[#allocation2 + $0x6f] sm:$0xff]  ;;  %387 = vst.msk [vmem:[#allocation2 + $0x1c8] sm:$0xff] %vm223_vm0, %v2560_v35  ;;  %388 = vst.msk [vmem:[#allocation2 + $0x1d0] sm:$0xff] %vm223_vm0, %v2561_v36 }
  0x40   : > { %2744 = vrot.lane.b32.xlu1 %v2743_v47, %s3438_s12  ;;  %v2773_v57 = vpack.i.bf16 %v3729_v56, %v3727_v55  ;;  %v620_v58 = vld [vmem:[#allocation2 + $0x68] sm:$0xff]  ;;  %v621_v59 = vld [vmem:[#allocation2 + $0x70] sm:$0xff]  ;;  %391 = vst.msk [vmem:[#allocation2 + $0x208] sm:$0xff] %vm223_vm0, %v2568_v2  ;;  %392 = vst.msk [vmem:[#allocation2 + $0x210] sm:$0xff] %vm223_vm0, %v2569_v3 }
  0x41   : > { %2739 = vrot.lane.b32.xlu0 %v2738_v48, %s3438_s12  ;;  %v2783_v62 = vpack.i.bf16 %v621_v59, %v620_v58  ;;  %v652_v7 = vld [vmem:[#allocation2 + $0x69] sm:$0xff]  ;;  %v653_v8 = vld [vmem:[#allocation2 + $0x71] sm:$0xff] }
  0x42   : > { %v2798_v10 = vpack.i.bf16 %v653_v8, %v652_v7  ;;  %v3755_v13 = vld [vmem:[#allocation2 + $0x87] sm:$0xff]  ;;  %v3757_v14 = vld [vmem:[#allocation2 + $0x8f] sm:$0xff] }
  0x43   : > { %v2823_v15 = vpack.i.bf16 %v3757_v14, %v3755_v13  ;;  %v527_v16 = vld [vmem:[#allocation2 + $0x88] sm:$0xff]  ;;  %v528_v17 = vld [vmem:[#allocation2 + $0x90] sm:$0xff] }
  0x44   : > { %2754 = vrot.lane.b32.xlu1 %v2753_v51, %s3439_s13  ;;  %v2833_v18 = vpack.i.bf16 %v528_v17, %v527_v16  ;;  %v559_v20 = vld [vmem:[#allocation2 + $0x89] sm:$0xff]  ;;  %v560_v21 = vld [vmem:[#allocation2 + $0x91] sm:$0xff] }
  0x45   : > { %2749 = vrot.lane.b32.xlu0 %v2728_v44, %s3439_s13  ;;  %v2843_v24 = vpack.i.bf16 %v560_v21, %v559_v20  ;;  %v3770_v25 = vld [vmem:[#allocation2 + $0xa7] sm:$0xff]  ;;  %v3772_v26 = vld [vmem:[#allocation2 + $0xaf] sm:$0xff] }
  0x46   : > { %v2853_v27 = vpack.i.bf16 %v3772_v26, %v3770_v25  ;;  %v624_v28 = vld [vmem:[#allocation2 + $0xa8] sm:$0xff]  ;;  %v625_v29 = vld [vmem:[#allocation2 + $0xb0] sm:$0xff] }
  0x47   : > { %v2863_v30 = vpack.i.bf16 %v625_v29, %v624_v28  ;;  %v656_v31 = vld [vmem:[#allocation2 + $0xa9] sm:$0xff]  ;;  %v657_v32 = vld [vmem:[#allocation2 + $0xb1] sm:$0xff] }
  0x48   : > { %2764 = vrot.lane.b32.xlu1 %v2763_v54, %s3440_s14  ;;  %v2878_v34 = vpack.i.bf16 %v657_v32, %v656_v31  ;;  %v499_v37 = vld [vmem:[#allocation2 + $0xc7] sm:$0xff]  ;;  %v500_v38 = vld [vmem:[#allocation2 + $0xcf] sm:$0xff] }
  0x49   : > { %2759 = vrot.lane.b32.xlu0 %v2733_v40, %s3440_s14  ;;  %v2903_v39 = vpack.i.bf16 %v500_v38, %v499_v37  ;;  %v531_v40 = vld [vmem:[#allocation2 + $0xc8] sm:$0xff]  ;;  %v532_v41 = vld [vmem:[#allocation2 + $0xd0] sm:$0xff] }
  0x4a   : > { %v2913_v44 = vpack.i.bf16 %v532_v41, %v531_v40  ;;  %v563_v48 = vld [vmem:[#allocation2 + $0xc9] sm:$0xff]  ;;  %v564_v49 = vld [vmem:[#allocation2 + $0xd1] sm:$0xff] }
  0x4b   : > { %v2923_v52 = vpack.i.bf16 %v564_v49, %v563_v48  ;;  %v596_v53 = vld [vmem:[#allocation2 + $0xe7] sm:$0xff]  ;;  %v629_v59 = vld [vmem:[#allocation2 + $0xf0] sm:$0xff] }
  0x4c   : > { %2774 = vrot.lane.b32.xlu1 %v2773_v57, %s3442_s15  ;;  %v628_v58 = vld [vmem:[#allocation2 + $0xe8] sm:$0xff]  ;;  %v536_v8 = vld [vmem:[#allocation2 + $0x110] sm:$0xff] }
  0x4d   : > { %2769 = vrot.lane.b32.xlu0 %v2743_v47, %s3442_s15  ;;  %v2583_v47 = vld [vmem:[%s3675_s9 + $0x70] sm:$0xff]   ;;  %v2943_v60 = vpack.i.bf16 %v629_v59, %v628_v58  ;;  %v503_v4 = vld [vmem:[#allocation2 + $0x107] sm:$0xff] }
  0x4e   : > { %v2564_v50 = vunpack.c.l.bf16 %v2583_v47  ;;  %v660_v61 = vld [vmem:[#allocation2 + $0xe9] sm:$0xff]  ;;  %v568_v11 = vld [vmem:[#allocation2 + $0x111] sm:$0xff] }
  0x4f   : > { %v504_v5 = vld [vmem:[#allocation2 + $0x10f] sm:$0xff] }
  0x50   : > { %2784 = vrot.lane.b32.xlu1 %v2783_v62, %s3443_s26  ;;  %389 = vst.msk [vmem:[#allocation2 + $0x1e8] sm:$0xff] %vm223_vm0, %v2564_v50  ;;  %v2983_v6 = vpack.i.bf16 %v504_v5, %v503_v4  ;;  %v535_v7 = vld [vmem:[#allocation2 + $0x108] sm:$0xff]  ;;  %v633_v21 = vld [vmem:[#allocation2 + $0x130] sm:$0xff] }
  0x51   : > { %2779 = vrot.lane.b32.xlu0 %v2753_v51, %s3443_s26  ;;  %v2993_v9 = vpack.i.bf16 %v536_v8, %v535_v7  ;;  %v601_v16 = vld [vmem:[#allocation2 + $0x12f] sm:$0xff] }
  0x52   : > { %v632_v20 = vld [vmem:[#allocation2 + $0x128] sm:$0xff]  ;;  %v665_v29 = vld [vmem:[#allocation2 + $0x131] sm:$0xff] }
  0x53   : > { %v3825_v22 = vpack.i.bf16 %v633_v21, %v632_v20  ;;  %v664_v28 = vld [vmem:[#allocation2 + $0x129] sm:$0xff] }
  0x54   : > { %2794 = vrot.lane.b32.xlu1 %v2753_v51, %s3437_s11  ;;  %v2565_v51 = vunpack.c.h.bf16 %v2583_v47  ;;  %v3839_v31 = vpack.i.bf16 %v665_v29, %v664_v28  ;;  %v508_v35 = vld [vmem:[#allocation2 + $0x14f] sm:$0xff] }
  0x55   : > { %2789 = vrot.lane.b32.xlu0 %v2763_v54, %s3444_s30  ;;  %v394_v40 = vld [vmem:[#allocation2 + $0xf] sm:$0xff] }
  0x56   : > { %390 = vst.msk [vmem:[#allocation2 + $0x1f0] sm:$0xff] %vm223_vm0, %v2565_v51  ;;  %v539_v51 = vld [vmem:[#allocation2 + $0x148] sm:$0xff] }
  0x57   : > { %v605_v63 = vld [vmem:[#allocation2 + $0x16f] sm:$0xff] }
  0x58   : > { %2804 = vrot.lane.b32.xlu1 %v2783_v62, %s3437_s11 }
  0x59   : > { %2799 = vrot.lane.b32.xlu0 %v2798_v10, %s3444_s30 }
  0x5c   : > { %2814 = vrot.lane.b32.xlu1 %v2798_v10, %s3436_s10 }
  0x5d   : > { %2809 = vrot.lane.b32.xlu0 %v2763_v54, %s3436_s10  ;;  %v597_v54 = vld [vmem:[#allocation2 + $0xef] sm:$0xff] }
  0x60   : > { %2824 = vrot.lane.b32.xlu1 %v2823_v15, %s3438_s12 }
  0x61   : > { %2819 = vrot.lane.b32.xlu0 %v2773_v57, %s3438_s12  ;;  %v2933_v57 = vpack.i.bf16 %v597_v54, %v596_v53  ;;  %v571_v53 = vld [vmem:[#allocation2 + $0x149] sm:$0xff] }
  0x64   : > { %2834 = vrot.lane.b32.xlu1 %v2833_v18, %s3439_s13 }
  0x65   : > { %2829 = vrot.lane.b32.xlu0 %v2783_v62, %s3439_s13  ;;  %v661_v62 = vld [vmem:[#allocation2 + $0xf1] sm:$0xff] }
  0x66   : > { %v2958_v1 = vpack.i.bf16 %v661_v62, %v660_v61  ;;  %v572_v61 = vld [vmem:[#allocation2 + $0x151] sm:$0xff]  ;;  %v604_v62 = vld [vmem:[#allocation2 + $0x167] sm:$0xff] }
  0x68   : > { %2844 = vrot.lane.b32.xlu1 %v2843_v24, %s3440_s14 }
  0x69   : > { %2839 = vrot.lane.b32.xlu0 %v2798_v10, %s3440_s14  ;;  %v567_v10 = vld [vmem:[#allocation2 + $0x109] sm:$0xff] }
  0x6a   : > { %v3003_v12 = vpack.i.bf16 %v568_v11, %v567_v10  ;;  %v3884_v10 = vpack.i.bf16 %v605_v63, %v604_v62 }
  0x6c   : > { %2854 = vrot.lane.b32.xlu1 %v2853_v27, %s3442_s15 }
  0x6d   : > { %2849 = vrot.lane.b32.xlu0 %v2823_v15, %s3442_s15  ;;  %v600_v15 = vld [vmem:[#allocation2 + $0x127] sm:$0xff] }
  0x70   : > { %2864 = vrot.lane.b32.xlu1 %v2863_v30, %s3443_s26 }
  0x71   : > { %2859 = vrot.lane.b32.xlu0 %v2833_v18, %s3443_s26 }
  0x74   : > { %2874 = vrot.lane.b32.xlu1 %v2833_v18, %s3437_s11  ;;  %v3820_v18 = vpack.i.bf16 %v601_v16, %v600_v15 }
  0x75   : > { %2869 = vrot.lane.b32.xlu0 %v2843_v24, %s3444_s30 }
  0x78   : > { %2884 = vrot.lane.b32.xlu1 %v2863_v30, %s3437_s11 }
  0x79   : > { %2879 = vrot.lane.b32.xlu0 %v2878_v34, %s3444_s30 }
  0x7c   : > { %2894 = vrot.lane.b32.xlu1 %v2878_v34, %s3436_s10 }
  0x7d   : > { %2889 = vrot.lane.b32.xlu0 %v2843_v24, %s3436_s10 }
  0x80   : > { %2904 = vrot.lane.b32.xlu1 %v2903_v39, %s3438_s12 }
  0x81   : > { %2899 = vrot.lane.b32.xlu0 %v2853_v27, %s3438_s12 }
  0x84   : > { %2914 = vrot.lane.b32.xlu1 %v2913_v44, %s3439_s13 }
  0x85   : > { %2909 = vrot.lane.b32.xlu0 %v2863_v30, %s3439_s13 }
  0x88   : > { %2924 = vrot.lane.b32.xlu1 %v2923_v52, %s3440_s14 }
  0x89   : > { %2919 = vrot.lane.b32.xlu0 %v2878_v34, %s3440_s14  ;;  %v507_v34 = vld [vmem:[#allocation2 + $0x147] sm:$0xff] }
  0x8a   : > { %v3855_v48 = vpack.i.bf16 %v508_v35, %v507_v34 }
  0x8b   : > { %v3818_v17 = vpop.permute.xlu1 %2724 }
  0x8c   : > { %2934 = vrot.lane.b32.xlu1 %v2933_v57, %s3442_s15  ;;  %v2720_v19 = vpop.permute.xlu0 %2719  ;;  %v2727_v49 = vunpack.i.h.bf16 %v3818_v17  ;;  %v2726_v50 = vunpack.i.l.bf16 %v3818_v17 }
  0x8d   : > { %2929 = vrot.lane.b32.xlu0 %v2903_v39, %s3442_s15  ;;  %v2722_v36 = vunpack.i.h.bf16 %v2720_v19  ;;  %v2721_v37 = vunpack.i.l.bf16 %v2720_v19  ;;  %v393_v39 = vld [vmem:[#allocation2 + $0x7] sm:$0xff] }
  0x8f   : > { %v1706_v54 = vsel %vm223_vm0, %v393_v39, %v2721_v37 }
  0x90   : > { %2944 = vrot.lane.b32.xlu1 %v2943_v60, %s3443_s26 }
  0x91   : > { %2939 = vrot.lane.b32.xlu0 %v2913_v44, %s3443_s26 }
  0x94   : > { %2954 = vrot.lane.b32.xlu1 %v2913_v44, %s3437_s11 }
  0x95   : > { %2949 = vrot.lane.b32.xlu0 %v2923_v52, %s3444_s30 }
  0x98   : > { %2964 = vrot.lane.b32.xlu1 %v2943_v60, %s3437_s11 }
  0x99   : > { %2959 = vrot.lane.b32.xlu0 %v2958_v1, %s3444_s30 }
  0x9c   : > { %2974 = vrot.lane.b32.xlu1 %v2958_v1, %s3436_s10 }
  0x9d   : > { %2969 = vrot.lane.b32.xlu0 %v2923_v52, %s3436_s10  ;;  %v540_v52 = vld [vmem:[#allocation2 + $0x150] sm:$0xff] }
  0x9e   : > { %v3876_v8 = vpack.i.bf16 %v540_v52, %v539_v51 }
  0xa0   : > { %2984 = vrot.lane.b32.xlu1 %v2983_v6, %s3438_s12 }
  0xa1   : > { %2979 = vrot.lane.b32.xlu0 %v2933_v57, %s3438_s12  ;;  %v1707_v57 = vsel %vm223_vm0, %v394_v40, %v2722_v36 }
  0xa4   : > { %2994 = vrot.lane.b32.xlu1 %v2993_v9, %s3439_s13 }
  0xa5   : > { %2989 = vrot.lane.b32.xlu0 %v2943_v60, %s3439_s13 }
  0xa8   : > { %3004 = vrot.lane.b32.xlu1 %v3003_v12, %s3440_s14 }
  0xa9   : > { %2999 = vrot.lane.b32.xlu0 %v2958_v1, %s3440_s14 }
  0xac   : > { %3014 = vrot.lane.b32.xlu1 %v3820_v18, %s3442_s15 }
  0xad   : > { %3009 = vrot.lane.b32.xlu0 %v2983_v6, %s3442_s15 }
  0xae   : > { %v3828_v23 = vpop.permute.xlu1 %2734 }
  0xaf   : > { %v2730_v24 = vpop.permute.xlu0 %2729  ;;  %v2737_v58 = vunpack.i.h.bf16 %v3828_v23  ;;  %v2736_v59 = vunpack.i.l.bf16 %v3828_v23 }
  0xb0   : > { %3024 = vrot.lane.b32.xlu1 %v3825_v22, %s3443_s26  ;;  %v2732_v41 = vunpack.i.h.bf16 %v2730_v24  ;;  %v2731_v44 = vunpack.i.l.bf16 %v2730_v24 }
  0xb1   : > { %3019 = vrot.lane.b32.xlu0 %v2993_v9, %s3443_s26 }
  0xb2   : > { %v3833_v27 = vpop.permute.xlu1 %2744  ;;  %v1708_v1 = vsel %vm223_vm0, %v3713_v45, %v2731_v44  ;;  %v1709_v2 = vsel %vm223_vm0, %v3715_v46, %v2732_v41  ;;  %v1739_v45 = vsel %vm1738_vm3, %v1706_v54, %v2726_v50  ;;  %v3882_v46 = vpack.i.bf16 %v572_v61, %v571_v53  ;;  %v636_v53 = vld [vmem:[#allocation2 + $0x168] sm:$0xff]  ;;  %v637_v54 = vld [vmem:[#allocation2 + $0x170] sm:$0xff] }
  0xb3   : > { %v3835_v30 = vpop.permute.xlu0 %2739  ;;  %v2747_v3 = vunpack.i.h.bf16 %v3833_v27  ;;  %v2746_v4 = vunpack.i.l.bf16 %v3833_v27  ;;  %v1741_v11 = vsel %vm1738_vm3, %v1708_v1, %v2736_v59 }
  0xb4   : > { %3034 = vrot.lane.b32.xlu1 %v2993_v9, %s3437_s11  ;;  %v2742_v6 = vunpack.i.h.bf16 %v3835_v30  ;;  %v2741_v7 = vunpack.i.l.bf16 %v3835_v30  ;;  %v1740_v9 = vsel %vm1738_vm3, %v1707_v57, %v2727_v49 }
  0xb5   : > { %3029 = vrot.lane.b32.xlu0 %v3003_v12, %s3444_s30  ;;  %v1774_v19 = vsel %vm1771_vm4, %v1741_v11, %v2746_v4 }
  0xb6   : > { %v3841_v32 = vpop.permute.xlu1 %2754  ;;  %v1773_v24 = vsel %vm1771_vm4, %v1740_v9, %v2742_v6  ;;  %v1772_v27 = vsel %vm1771_vm4, %v1739_v45, %v2741_v7  ;;  %v3928_v6 = vpack.i.bf16 %v637_v54, %v636_v53 }
  0xb7   : > { %v3843_v33 = vpop.permute.xlu0 %2749  ;;  %v2757_v30 = vunpack.i.h.bf16 %v3841_v32 }
  0xb8   : > { %3044 = vrot.lane.b32.xlu1 %v3825_v22, %s3437_s11  ;;  %v2752_v15 = vunpack.i.h.bf16 %v3843_v33  ;;  %v2751_v16 = vunpack.i.l.bf16 %v3843_v33  ;;  %v2756_v33 = vunpack.i.l.bf16 %v3841_v32 }
  0xb9   : > { %3039 = vrot.lane.b32.xlu0 %v3839_v31, %s3444_s30 }
  0xba   : > { %v3849_v38 = vpop.permute.xlu1 %2764  ;;  %v1805_v36 = vsel %vm1804_vm5, %v1772_v27, %v2751_v16  ;;  %v1806_v37 = vsel %vm1804_vm5, %v1773_v24, %v2752_v15  ;;  %v1807_v61 = vsel %vm1804_vm5, %v1774_v19, %v2756_v33  ;;  %v512_v33 = vld [vmem:[#allocation2 + $0x18f] sm:$0xff] }
  0xbb   : > { %v3851_v47 = vpop.permute.xlu0 %2759  ;;  %v2767_v39 = vunpack.i.h.bf16 %v3849_v38  ;;  %v2766_v40 = vunpack.i.l.bf16 %v3849_v38 }
  0xbc   : > { %3054 = vrot.lane.b32.xlu1 %v3839_v31, %s3436_s10  ;;  %v2761_v21 = vunpack.i.l.bf16 %v3851_v47 }
  0xbd   : > { %3049 = vrot.lane.b32.xlu0 %v3003_v12, %s3436_s10  ;;  %v1742_v12 = vsel %vm1738_vm3, %v1709_v2, %v2737_v58 }
  0xbe   : > { %v3864_v60 = vpop.permute.xlu1 %2774  ;;  %v1775_v20 = vsel %vm1771_vm4, %v1742_v12, %v2747_v3  ;;  %v1838_v44 = vsel %vm1837_vm6, %v1805_v36, %v2761_v21  ;;  %v1840_v3 = vsel %vm1837_vm6, %v1807_v61, %v2766_v40  ;;  %v544_v36 = vld [vmem:[#allocation2 + $0x190] sm:$0xff] }
  0xbf   : > { %v2770_v5 = vpop.permute.xlu0 %2769  ;;  %v2777_v32 = vunpack.i.h.bf16 %v3864_v60  ;;  %v2776_v49 = vunpack.i.l.bf16 %v3864_v60  ;;  %v1808_v62 = vsel %vm1804_vm5, %v1775_v20, %v2757_v30  ;;  %v511_v30 = vld [vmem:[#allocation2 + $0x187] sm:$0xff] }
  0xc0   : > { %3064 = vrot.lane.b32.xlu1 %v3855_v48, %s3438_s12  ;;  %v2772_v28 = vunpack.i.h.bf16 %v2770_v5  ;;  %v2771_v29 = vunpack.i.l.bf16 %v2770_v5  ;;  %v1841_v4 = vsel %vm1837_vm6, %v1808_v62, %v2767_v39 }
  0xc1   : > { %3059 = vrot.lane.b32.xlu0 %v3820_v18, %s3438_s12  ;;  %v2762_v18 = vunpack.i.h.bf16 %v3851_v47  ;;  %v1873_v7 = vsel %vm1870_vm7, %v1840_v3, %v2776_v49  ;;  %v1874_v45 = vsel %vm1870_vm7, %v1841_v4, %v2777_v32  ;;  %v608_v32 = vld [vmem:[#allocation2 + $0x1a7] sm:$0xff]  ;;  %v609_v49 = vld [vmem:[#allocation2 + $0x1af] sm:$0xff] }
  0xc2   : > { %v2785_v17 = vpop.permute.xlu1 %2784  ;;  %v1871_v52 = vsel %vm1870_vm7, %v1838_v44, %v2771_v29  ;;  %v3968_v44 = vpack.i.bf16 %v512_v33, %v511_v30  ;;  %v3980_v62 = vpack.i.bf16 %v609_v49, %v608_v32 }
  0xc3   : > { %v2780_v23 = vpop.permute.xlu0 %2779  ;;  %v1839_v47 = vsel %vm1837_vm6, %v1806_v37, %v2762_v18  ;;  %v2787_v57 = vunpack.i.h.bf16 %v2785_v17  ;;  %v2786_v58 = vunpack.i.l.bf16 %v2785_v17  ;;  %v575_v37 = vld [vmem:[#allocation2 + $0x189] sm:$0xff] }
  0xc4   : > { %3074 = vrot.lane.b32.xlu1 %v3876_v8, %s3439_s13  ;;  %v2782_v34 = vunpack.i.h.bf16 %v2780_v23  ;;  %v2781_v35 = vunpack.i.l.bf16 %v2780_v23  ;;  %v1872_v38 = vsel %vm1870_vm7, %v1839_v47, %v2772_v28  ;;  %v668_v23 = vld [vmem:[#allocation2 + $0x169] sm:$0xff]  ;;  %v576_v47 = vld [vmem:[#allocation2 + $0x191] sm:$0xff] }
  0xc5   : > { %3069 = vrot.lane.b32.xlu0 %v3825_v22, %s3439_s13  ;;  %v1906_v12 = vsel %vm1903_vm8, %v1873_v7, %v2786_v58  ;;  %v1907_v15 = vsel %vm1903_vm8, %v1874_v45, %v2787_v57  ;;  %v3978_v61 = vpack.i.bf16 %v576_v47, %v575_v37  ;;  %v641_v47 = vld [vmem:[#allocation2 + $0x1b0] sm:$0xff] }
  0xc6   : > { %v3906_v41 = vpop.permute.xlu1 %2794  ;;  %v1904_v59 = vsel %vm1903_vm8, %v1871_v52, %v2781_v35  ;;  %v1905_v60 = vsel %vm1903_vm8, %v1872_v38, %v2782_v34  ;;  %v543_v35 = vld [vmem:[#allocation2 + $0x188] sm:$0xff] }
  0xc7   : > { %v2790_v50 = vpop.permute.xlu0 %2789  ;;  %v3976_v57 = vpack.i.bf16 %v544_v36, %v543_v35 }
  0xc8   : > { %v2792_v22 = vunpack.i.h.bf16 %v2790_v50  ;;  %v2791_v51 = vunpack.i.l.bf16 %v2790_v50  ;;  %3084 = vrot.lane.b32.xlu1 %v3882_v46, %s3440_s14  ;;  %v2797_v50 = vunpack.i.h.bf16 %v3906_v41 }
  0xc9   : > { %3079 = vrot.lane.b32.xlu0 %v3839_v31, %s3440_s14 }
  0xca   : > { %v3922_v63 = vpop.permute.xlu1 %2804  ;;  %v1937_v1 = vsel %vm1936_vm9, %v1904_v59, %v2791_v51  ;;  %v1938_v2 = vsel %vm1936_vm9, %v1905_v60, %v2792_v22  ;;  %v2796_v22 = vunpack.i.l.bf16 %v3906_v41 }
  0xcb   : > { %v2800_v5 = vpop.permute.xlu0 %2799  ;;  %v1969_v31 = vpack.c.bf16 %v1938_v2, %v1937_v1  ;;  %v2807_v39 = vunpack.i.h.bf16 %v3922_v63  ;;  %v2806_v40 = vunpack.i.l.bf16 %v3922_v63  ;;  %v1711_v2 = vsel %vm223_vm0, %v3711_v43, %v2797_v50 }
  0xcc   : > { %v2802_v9 = vunpack.i.h.bf16 %v2800_v5  ;;  %v2801_v11 = vunpack.i.l.bf16 %v2800_v5  ;;  %3094 = vrot.lane.b32.xlu1 %v3884_v10, %s3442_s15  ;;  %v1710_v3 = vsel %vm223_vm0, %v3709_v42, %v2796_v22 }
  0xcd   : > { %3089 = vrot.lane.b32.xlu0 %v3855_v48, %s3442_s15  ;;  %2616 = vmatprep.mubr.msk.bf16.mxu0 %vm2007_vm10, %v1969_v31  ;;  %v669_v48 = vld [vmem:[#allocation2 + $0x171] sm:$0xff]  ;;  %v1713_v41 = vsel %vm223_vm0, %v3729_v56, %v2807_v39  ;;  %v1712_v63 = vsel %vm223_vm0, %v3727_v55, %v2806_v40 }
  0xce   : > { %v1939_v16 = vsel %vm1936_vm9, %v1906_v12, %v2801_v11  ;;  %v1940_v17 = vsel %vm1936_vm9, %v1907_v15, %v2802_v9  ;;  %v2815_v19 = vpop.permute.xlu1 %2814  ;;  %v3950_v27 = vpack.i.bf16 %v669_v48, %v668_v23 }
  0xcf   : > { %v2810_v20 = vpop.permute.xlu0 %2809  ;;  %v1970_v18 = vpack.c.bf16 %v1940_v17, %v1939_v16  ;;  %v2817_v51 = vunpack.i.h.bf16 %v2815_v19  ;;  %v2816_v52 = vunpack.i.l.bf16 %v2815_v19 }
  0xd0   : > { %3104 = vrot.lane.b32.xlu1 %v3928_v6, %s3443_s26  ;;  %v2812_v38 = vunpack.i.h.bf16 %v2810_v20  ;;  %v2811_v53 = vunpack.i.l.bf16 %v2810_v20 }
  0xd1   : > { %3099 = vrot.lane.b32.xlu0 %v3876_v8, %s3443_s26  ;;  %2617 = vmatmul.mubr.msk.bf16.vlgmr.msra.gmra.mrb[0].mxu0 %vm2007_vm10, %v1970_v18  ;;  %v1745_v4 = vsel %vm1738_vm3, %v1712_v63, %v2816_v52  ;;  %v1746_v5 = vsel %vm1738_vm3, %v1713_v41, %v2817_v51 }
  0xd2   : > { %v2825_v21 = vpop.permute.xlu1 %2824  ;;  %v1744_v55 = vsel %vm1738_vm3, %v1711_v2, %v2812_v38  ;;  %v1743_v56 = vsel %vm1738_vm3, %v1710_v3, %v2811_v53 }
  0xd3   : > { %v2820_v24 = vpop.permute.xlu0 %2819  ;;  %v2827_v58 = vunpack.i.h.bf16 %v2825_v21  ;;  %v2826_v59 = vunpack.i.l.bf16 %v2825_v21 }
  0xd4   : > { %3114 = vrot.lane.b32.xlu1 %v3876_v8, %s3437_s11  ;;  %v2821_v1 = vunpack.i.l.bf16 %v2820_v24 }
  0xd5   : > { %3109 = vrot.lane.b32.xlu0 %v3882_v46, %s3444_s30  ;;  %v1778_v43 = vsel %vm1771_vm4, %v1745_v4, %v2826_v59  ;;  %v1779_v42 = vsel %vm1771_vm4, %v1746_v5, %v2827_v58 }
  0xd6   : > { %v3952_v28 = vpop.permute.xlu1 %2834 }
  0xd7   : > { %v3954_v29 = vpop.permute.xlu0 %2829  ;;  %v2837_v19 = vunpack.i.h.bf16 %v3952_v28  ;;  %v2836_v20 = vunpack.i.l.bf16 %v3952_v28 }
  0xd8   : > { %3124 = vrot.lane.b32.xlu1 %v3928_v6, %s3437_s11  ;;  %v2832_v31 = vunpack.i.h.bf16 %v3954_v29  ;;  %v2831_v7 = vunpack.i.l.bf16 %v3954_v29 }
  0xd9   : > { %3119 = vrot.lane.b32.xlu0 %v3950_v27, %s3444_s30  ;;  %v1811_v51 = vsel %vm1804_vm5, %v1778_v43, %v2836_v20  ;;  %v1812_v52 = vsel %vm1804_vm5, %v1779_v42, %v2837_v19  ;;  %v672_v43 = vld [vmem:[#allocation2 + $0x1a9] sm:$0xff] }
  0xda   : > { %v3960_v34 = vpop.permute.xlu1 %2844  ;;  %v548_v19 = vld [vmem:[#allocation2 + $0x1d0] sm:$0xff] }
  0xdb   : > { %v3962_v8 = vpop.permute.xlu0 %2839  ;;  %v2846_v29 = vunpack.i.l.bf16 %v3960_v34  ;;  %v579_v20 = vld [vmem:[#allocation2 + $0x1c9] sm:$0xff] }
  0xdc   : > { %3134 = vrot.lane.b32.xlu1 %v3950_v27, %s3436_s10  ;;  %v2842_v9 = vunpack.i.h.bf16 %v3962_v8  ;;  %v2841_v11 = vunpack.i.l.bf16 %v3962_v8 }
  0xdd   : > { %3129 = vrot.lane.b32.xlu0 %v3882_v46, %s3436_s10  ;;  %v2822_v46 = vunpack.i.h.bf16 %v2820_v24  ;;  %v2847_v24 = vunpack.i.h.bf16 %v3960_v34  ;;  %v640_v34 = vld [vmem:[#allocation2 + $0x1a8] sm:$0xff]  ;;  %v1844_v58 = vsel %vm1837_vm6, %v1811_v51, %v2846_v29 }
  0xde   : > { %v3974_v54 = vpop.permute.xlu1 %2854  ;;  %v4038_v63 = vpack.i.bf16 %v641_v47, %v640_v34  ;;  %v4085_v29 = vld [vmem:[#allocation2 + $0x1ef] sm:$0xff] }
  0xdf   : > { %v2850_v60 = vpop.permute.xlu0 %2849  ;;  %v1777_v15 = vsel %vm1771_vm4, %v1744_v55, %v2822_v46  ;;  %v2857_v28 = vunpack.i.h.bf16 %v3974_v54  ;;  %v2856_v35 = vunpack.i.l.bf16 %v3974_v54  ;;  %v1845_v59 = vsel %vm1837_vm6, %v1812_v52, %v2847_v24  ;;  %v4083_v24 = vld [vmem:[#allocation2 + $0x1e7] sm:$0xff] }
  0xe0   : > { %3144 = vrot.lane.b32.xlu1 %v3968_v44, %s3438_s12  ;;  %v2852_v16 = vunpack.i.h.bf16 %v2850_v60  ;;  %v2851_v17 = vunpack.i.l.bf16 %v2850_v60  ;;  %v1810_v48 = vsel %vm1804_vm5, %v1777_v15, %v2832_v31  ;;  %v4070_v15 = vld [vmem:[#allocation2 + $0x1cf] sm:$0xff] }
  0xe1   : > { %3139 = vrot.lane.b32.xlu0 %v3884_v10, %s3438_s12  ;;  %v1776_v10 = vsel %vm1771_vm4, %v1743_v56, %v2821_v1  ;;  %v1843_v8 = vsel %vm1837_vm6, %v1810_v48, %v2842_v9  ;;  %v1878_v46 = vsel %vm1870_vm7, %v1845_v59, %v2857_v28  ;;  %v580_v48 = vld [vmem:[#allocation2 + $0x1d1] sm:$0xff] }
  0xe2   : > { %v2865_v45 = vpop.permute.xlu1 %2864  ;;  %v1809_v23 = vsel %vm1804_vm5, %v1776_v10, %v2831_v7  ;;  %v1876_v37 = vsel %vm1870_vm7, %v1843_v8, %v2852_v16  ;;  %v515_v10 = vld [vmem:[#allocation2 + $0x1c7] sm:$0xff] }
  0xe3   : > { %v2860_v12 = vpop.permute.xlu0 %2859  ;;  %v1842_v33 = vsel %vm1837_vm6, %v1809_v23, %v2841_v11  ;;  %v2867_v32 = vunpack.i.h.bf16 %v2865_v45  ;;  %v2866_v49 = vunpack.i.l.bf16 %v2865_v45  ;;  %v4081_v23 = vpack.i.bf16 %v4070_v15, %v515_v10 }
  0xe4   : > { %3154 = vrot.lane.b32.xlu1 %v3976_v57, %s3439_s13  ;;  %v2862_v18 = vunpack.i.h.bf16 %v2860_v12  ;;  %v2861_v21 = vunpack.i.l.bf16 %v2860_v12 }
  0xe5   : > { %3149 = vrot.lane.b32.xlu0 %v3928_v6, %s3439_s13  ;;  %v1875_v6 = vsel %vm1870_vm7, %v1842_v33, %v2851_v17  ;;  %v1911_v4 = vsel %vm1903_vm8, %v1878_v46, %v2867_v32  ;;  %v547_v17 = vld [vmem:[#allocation2 + $0x1c8] sm:$0xff]  ;;  %v4095_v32 = vpack.i.bf16 %v580_v48, %v579_v20  ;;  %v645_v20 = vld [vmem:[#allocation2 + $0x1f0] sm:$0xff] }
  0xe6   : > { %v4016_v30 = vpop.permute.xlu1 %2874  ;;  %v1908_v50 = vsel %vm1903_vm8, %v1875_v6, %v2861_v21  ;;  %v1909_v22 = vsel %vm1903_vm8, %v1876_v37, %v2862_v18 }
  0xe7   : > { %v2870_v36 = vpop.permute.xlu0 %2869  ;;  %v2877_v33 = vunpack.i.h.bf16 %v4016_v30  ;;  %v2876_v8 = vunpack.i.l.bf16 %v4016_v30 }
  0xe8   : > { %v2872_v39 = vunpack.i.h.bf16 %v2870_v36  ;;  %v2871_v40 = vunpack.i.l.bf16 %v2870_v36  ;;  %3164 = vrot.lane.b32.xlu1 %v3978_v61, %s3440_s14 }
  0xe9   : > { %3159 = vrot.lane.b32.xlu0 %v3950_v27, %s3440_s14  ;;  %v1877_v27 = vsel %vm1870_vm7, %v1844_v58, %v2856_v35  ;;  %v1715_v51 = vsel %vm223_vm0, %v3757_v14, %v2877_v33  ;;  %v1714_v52 = vsel %vm223_vm0, %v3755_v13, %v2876_v8 }
  0xea   : > { %v1941_v38 = vsel %vm1936_vm9, %v1908_v50, %v2871_v40  ;;  %v1942_v53 = vsel %vm1936_vm9, %v1909_v22, %v2872_v39  ;;  %v4034_v54 = vpop.permute.xlu1 %2884  ;;  %v1910_v3 = vsel %vm1903_vm8, %v1877_v27, %v2866_v49  ;;  %v4093_v39 = vpack.i.bf16 %v548_v19, %v547_v17 }
  0xeb   : > { %v1971_v60 = vpack.c.bf16 %v1942_v53, %v1941_v38  ;;  %v2880_v41 = vpop.permute.xlu0 %2879  ;;  %v2887_v18 = vunpack.i.h.bf16 %v4034_v54  ;;  %v2886_v21 = vunpack.i.l.bf16 %v4034_v54  ;;  %v4099_v49 = vpack.i.bf16 %v4085_v29, %v4083_v24 }
  0xec   : > { %v2882_v1 = vunpack.i.h.bf16 %v2880_v41  ;;  %v2881_v2 = vunpack.i.l.bf16 %v2880_v41  ;;  %3174 = vrot.lane.b32.xlu1 %v3980_v62, %s3442_s15 }
  0xed   : > { %3169 = vrot.lane.b32.xlu0 %v3968_v44, %s3442_s15  ;;  %2620 = vmatprep.mubr.msk.bf16.mxu0 %vm2007_vm10, %v1971_v60  ;;  %v673_v44 = vld [vmem:[#allocation2 + $0x1b1] sm:$0xff]  ;;  %v1717_v30 = vsel %vm223_vm0, %v3772_v26, %v2887_v18 }
  0xee   : > { %v1944_v5 = vsel %vm1936_vm9, %v1911_v4, %v2882_v1  ;;  %v1943_v55 = vsel %vm1936_vm9, %v1910_v3, %v2881_v2  ;;  %v2895_v56 = vpop.permute.xlu1 %2894  ;;  %v4060_v9 = vpack.i.bf16 %v673_v44, %v672_v43 }
  0xef   : > { %v1972_v31 = vpack.c.bf16 %v1944_v5, %v1943_v55  ;;  %v2890_v7 = vpop.permute.xlu0 %2889  ;;  %v2897_v28 = vunpack.i.h.bf16 %v2895_v56  ;;  %v2896_v35 = vunpack.i.l.bf16 %v2895_v56 }
  0xf0   : > { %3184 = vrot.lane.b32.xlu1 %v4038_v63, %s3443_s26  ;;  %v2892_v36 = vunpack.i.h.bf16 %v2890_v7  ;;  %v2891_v6 = vunpack.i.l.bf16 %v2890_v7 }
  0xf1   : > { %3179 = vrot.lane.b32.xlu0 %v3976_v57, %s3443_s26  ;;  %2621 = vmatmul.mubr.msk.bf16.gmra.mrb[4].mxu0 %vm2007_vm10, %v1972_v31  ;;  %v1750_v53 = vsel %vm1738_vm3, %v1717_v30, %v2897_v28 }
  0xf2   : > { %v2905_v45 = vpop.permute.xlu1 %2904  ;;  %v1747_v26 = vsel %vm1738_vm3, %v1714_v52, %v2891_v6 }
  0xf3   : > { %v2900_v42 = vpop.permute.xlu0 %2899  ;;  %v2907_v40 = vunpack.i.h.bf16 %v2905_v45  ;;  %v2906_v34 = vunpack.i.l.bf16 %v2905_v45 }
  0xf4   : > { %3194 = vrot.lane.b32.xlu1 %v3976_v57, %s3437_s11  ;;  %v2902_v50 = vunpack.i.h.bf16 %v2900_v42  ;;  %v2901_v22 = vunpack.i.l.bf16 %v2900_v42 }
  0xf5   : > { %3189 = vrot.lane.b32.xlu0 %v3978_v61, %s3444_s30  ;;  %v1783_v13 = vsel %vm1771_vm4, %v1750_v53, %v2907_v40 }
  0xf6   : > { %v4062_v11 = vpop.permute.xlu1 %2914 }
  0xf7   : > { %v4064_v12 = vpop.permute.xlu0 %2909  ;;  %v2917_v3 = vunpack.i.h.bf16 %v4062_v11  ;;  %v2916_v4 = vunpack.i.l.bf16 %v4062_v11 }
  0xf8   : > { %3204 = vrot.lane.b32.xlu1 %v4038_v63, %s3437_s11  ;;  %v2912_v54 = vunpack.i.h.bf16 %v4064_v12  ;;  %v2911_v58 = vunpack.i.l.bf16 %v4064_v12 }
  0xf9   : > { %3199 = vrot.lane.b32.xlu0 %v4060_v9, %s3444_s30  ;;  %v1816_v28 = vsel %vm1804_vm5, %v1783_v13, %v2917_v3  ;;  %v583_v3 = vld [vmem:[#allocation2 + $0x209] sm:$0xff] }
  0xfa   : > { %v4072_v16 = vpop.permute.xlu1 %2924 }
  0xfb   : > { %v4074_v57 = vpop.permute.xlu0 %2919  ;;  %v2927_v7 = vunpack.i.h.bf16 %v4072_v16  ;;  %v2926_v45 = vunpack.i.l.bf16 %v4072_v16  ;;  %v644_v16 = vld [vmem:[#allocation2 + $0x1e8] sm:$0xff] }
  0xfc   : > { %3214 = vrot.lane.b32.xlu1 %v4060_v9, %s3436_s10  ;;  %v2922_v60 = vunpack.i.h.bf16 %v4074_v57  ;;  %v2921_v41 = vunpack.i.l.bf16 %v4074_v57  ;;  %v4157_v30 = vpack.i.bf16 %v645_v20, %v644_v16 }
  0xfd   : > { %3209 = vrot.lane.b32.xlu0 %v3978_v61, %s3436_s10  ;;  %v1716_v61 = vsel %vm223_vm0, %v3770_v25, %v2886_v21  ;;  %v1748_v25 = vsel %vm1738_vm3, %v1715_v51, %v2892_v36  ;;  %v1849_v40 = vsel %vm1837_vm6, %v1816_v28, %v2927_v7  ;;  %v4203_v7 = vld [vmem:[#allocation2 + $0x22f] sm:$0xff] }
  0xfe   : > { %v4091_v37 = vpop.permute.xlu1 %2934  ;;  %v1749_v38 = vsel %vm1738_vm3, %v1716_v61, %v2896_v35  ;;  %v1781_v46 = vsel %vm1771_vm4, %v1748_v25, %v2902_v50 }
  0xff   : > { %v2930_v47 = vpop.permute.xlu0 %2929  ;;  %v1782_v14 = vsel %vm1771_vm4, %v1749_v38, %v2906_v34  ;;  %v1814_v31 = vsel %vm1804_vm5, %v1781_v46, %v2912_v54  ;;  %v2937_v11 = vunpack.i.h.bf16 %v4091_v37  ;;  %v2936_v12 = vunpack.i.l.bf16 %v4091_v37 }
 0x100   : > { %3224 = vrot.lane.b32.xlu1 %v4081_v23, %s3438_s12  ;;  %v2932_v1 = vunpack.i.h.bf16 %v2930_v47  ;;  %v2931_v2 = vunpack.i.l.bf16 %v2930_v47  ;;  %v1847_v42 = vsel %vm1837_vm6, %v1814_v31, %v2922_v60  ;;  %v1815_v8 = vsel %vm1804_vm5, %v1782_v14, %v2916_v4  ;;  %v4201_v31 = vld [vmem:[#allocation2 + $0x227] sm:$0xff] }
 0x101   : > { %3219 = vrot.lane.b32.xlu0 %v3980_v62, %s3438_s12  ;;  %v1780_v62 = vsel %vm1771_vm4, %v1747_v26, %v2901_v22  ;;  %v1848_v37 = vsel %vm1837_vm6, %v1815_v8, %v2926_v45  ;;  %v1882_v61 = vsel %vm1870_vm7, %v1849_v40, %v2937_v11  ;;  %v408_v11 = vld [vmem:[#allocation2 + $0xef] sm:$0xff] }
 0x102   : > { %v2945_v59 = vpop.permute.xlu1 %2944  ;;  %v1813_v56 = vsel %vm1804_vm5, %v1780_v62, %v2911_v58  ;;  %v1880_v57 = vsel %vm1870_vm7, %v1847_v42, %v2932_v1  ;;  %v520_v62 = vld [vmem:[#allocation2 + $0x20f] sm:$0xff]  ;;  %v407_v42 = vld [vmem:[#allocation2 + $0xe7] sm:$0xff] }
 0x103   : > { %v2940_v27 = vpop.permute.xlu0 %2939  ;;  %v1846_v44 = vsel %vm1837_vm6, %v1813_v56, %v2921_v41  ;;  %v2947_v18 = vunpack.i.h.bf16 %v2945_v59  ;;  %v2946_v21 = vunpack.i.l.bf16 %v2945_v59  ;;  %v676_v59 = vld [vmem:[#allocation2 + $0x1e9] sm:$0xff]  ;;  %v584_v56 = vld [vmem:[#allocation2 + $0x211] sm:$0xff] }
 0x104   : > { %3234 = vrot.lane.b32.xlu1 %v4093_v39, %s3439_s13  ;;  %v2942_v5 = vunpack.i.h.bf16 %v2940_v27  ;;  %v2941_v55 = vunpack.i.l.bf16 %v2940_v27  ;;  %v519_v27 = vld [vmem:[#allocation2 + $0x207] sm:$0xff] }
 0x105   : > { %3229 = vrot.lane.b32.xlu0 %v4038_v63, %s3439_s13  ;;  %v1879_v63 = vsel %vm1870_vm7, %v1846_v44, %v2931_v2  ;;  %v1915_v52 = vsel %vm1903_vm8, %v1882_v61, %v2947_v18  ;;  %v551_v1 = vld [vmem:[#allocation2 + $0x208] sm:$0xff]  ;;  %v552_v2 = vld [vmem:[#allocation2 + $0x210] sm:$0xff] }
 0x106   : > { %v4135_v43 = vpop.permute.xlu1 %2954  ;;  %v1912_v48 = vsel %vm1903_vm8, %v1879_v63, %v2941_v55  ;;  %v1913_v33 = vsel %vm1903_vm8, %v1880_v57, %v2942_v5  ;;  %v4199_v55 = vpack.i.bf16 %v520_v62, %v519_v27  ;;  %v405_v63 = vld [vmem:[#allocation2 + $0xc7] sm:$0xff]  ;;  %v406_v57 = vld [vmem:[#allocation2 + $0xcf] sm:$0xff]  ;;  %v4211_v20 = vpack.i.bf16 %v552_v2, %v551_v1 }
 0x107   : > { %v2950_v10 = vpop.permute.xlu0 %2949  ;;  %v2957_v45 = vunpack.i.h.bf16 %v4135_v43  ;;  %v2956_v44 = vunpack.i.l.bf16 %v4135_v43  ;;  %v3333_v43 = vpack.i.bf16 %v4203_v7, %v4201_v31 }
 0x108   : > { %v2952_v17 = vunpack.i.h.bf16 %v2950_v10  ;;  %v2951_v19 = vunpack.i.l.bf16 %v2950_v10  ;;  %3244 = vrot.lane.b32.xlu1 %v4095_v32, %s3440_s14 }
 0x109   : > { %3239 = vrot.lane.b32.xlu0 %v4060_v9, %s3440_s14  ;;  %v1881_v9 = vsel %vm1870_vm7, %v1848_v37, %v2936_v12 }
 0x10a   : > { %v1945_v35 = vsel %vm1936_vm9, %v1912_v48, %v2951_v19  ;;  %v1946_v36 = vsel %vm1936_vm9, %v1913_v33, %v2952_v17  ;;  %v4153_v6 = vpop.permute.xlu1 %2964  ;;  %v1914_v51 = vsel %vm1903_vm8, %v1881_v9, %v2946_v21  ;;  %v4213_v33 = vpack.i.bf16 %v584_v56, %v583_v3 }
 0x10b   : > { %v1973_v34 = vpack.c.bf16 %v1946_v36, %v1945_v35  ;;  %v2960_v47 = vpop.permute.xlu0 %2959  ;;  %v2967_v4 = vunpack.i.h.bf16 %v4153_v6  ;;  %v2966_v5 = vunpack.i.l.bf16 %v4153_v6  ;;  %v1719_v36 = vsel %vm223_vm0, %v406_v57, %v2957_v45 }
 0x10c   : > { %v2962_v50 = vunpack.i.h.bf16 %v2960_v47  ;;  %v2961_v22 = vunpack.i.l.bf16 %v2960_v47  ;;  %3254 = vrot.lane.b32.xlu1 %v4099_v49, %s3442_s15  ;;  %v1718_v6 = vsel %vm223_vm0, %v405_v63, %v2956_v44 }
 0x10d   : > { %3249 = vrot.lane.b32.xlu0 %v4081_v23, %s3442_s15  ;;  %2624 = vmatprep.mubr.msk.bf16.mxu0 %vm2007_vm10, %v1973_v34  ;;  %v677_v23 = vld [vmem:[#allocation2 + $0x1f1] sm:$0xff]  ;;  %v1721_v8 = vsel %vm223_vm0, %v408_v11, %v2967_v4 }
 0x10e   : > { %v1948_v38 = vsel %vm1936_vm9, %v1915_v52, %v2962_v50  ;;  %v1947_v53 = vsel %vm1936_vm9, %v1914_v51, %v2961_v22  ;;  %v2975_v25 = vpop.permute.xlu1 %2974  ;;  %v4181_v13 = vpack.i.bf16 %v677_v23, %v676_v59 }
 0x10f   : > { %v1974_v26 = vpack.c.bf16 %v1948_v38, %v1947_v53  ;;  %v2970_v54 = vpop.permute.xlu0 %2969  ;;  %v2977_v12 = vunpack.i.h.bf16 %v2975_v25  ;;  %v2976_v10 = vunpack.i.l.bf16 %v2975_v25 }
 0x110   : > { %3264 = vrot.lane.b32.xlu1 %v4157_v30, %s3443_s26  ;;  %v2972_v17 = vunpack.i.h.bf16 %v2970_v54  ;;  %v2971_v19 = vunpack.i.l.bf16 %v2970_v54 }
 0x111   : > { %3259 = vrot.lane.b32.xlu0 %v4093_v39, %s3443_s26  ;;  %2625 = vmatmul.mubr.msk.bf16.gmra.mrb[8].mxu0 %vm2007_vm10, %v1974_v26  ;;  %v1754_v40 = vsel %vm1738_vm3, %v1721_v8, %v2977_v12 }
 0x112   : > { %v2985_v58 = vpop.permute.xlu1 %2984  ;;  %v1752_v34 = vsel %vm1738_vm3, %v1719_v36, %v2972_v17  ;;  %v1751_v47 = vsel %vm1738_vm3, %v1718_v6, %v2971_v19 }
 0x113   : > { %v4175_v14 = vpop.permute.xlu0 %2979  ;;  %v2987_v18 = vunpack.i.h.bf16 %v2985_v58  ;;  %v2986_v21 = vunpack.i.l.bf16 %v2985_v58 }
 0x114   : > { %3274 = vrot.lane.b32.xlu1 %v4093_v39, %s3437_s11  ;;  %v2982_v28 = vunpack.i.h.bf16 %v4175_v14  ;;  %v2981_v35 = vunpack.i.l.bf16 %v4175_v14 }
 0x115   : > { %3269 = vrot.lane.b32.xlu0 %v4095_v32, %s3444_s30  ;;  %v1787_v51 = vsel %vm1771_vm4, %v1754_v40, %v2987_v18 }
 0x116   : > { %v4183_v60 = vpop.permute.xlu1 %2994  ;;  %v1785_v25 = vsel %vm1771_vm4, %v1752_v34, %v2982_v28  ;;  %v680_v34 = vld [vmem:[#allocation2 + $0x229] sm:$0xff] }
 0x117   : > { %v4185_v41 = vpop.permute.xlu0 %2989  ;;  %v2997_v58 = vunpack.i.h.bf16 %v4183_v60  ;;  %v2996_v59 = vunpack.i.l.bf16 %v4183_v60 }
 0x118   : > { %3284 = vrot.lane.b32.xlu1 %v4157_v30, %s3437_s11  ;;  %v2992_v9 = vunpack.i.h.bf16 %v4185_v41  ;;  %v2991_v61 = vunpack.i.l.bf16 %v4185_v41  ;;  %s2502_s11 = sshll.u32 %s3498_s22, 4 }
 0x119   : > { %3279 = vrot.lane.b32.xlu0 %v4181_v13, %s3444_s30  ;;  %v1820_v17 = vsel %vm1804_vm5, %v1787_v51, %v2997_v58  ;;  %v412_v58 = vld [vmem:[#allocation2 + $0x12f] sm:$0xff]  ;;  %s4539_s16 = scalar_lea.hbm %s4586_s5, %s2502_s11 }
 0x11a   : > { %v4191_v46 = vpop.permute.xlu1 %3004  ;;  %v1818_v27 = vsel %vm1804_vm5, %v1785_v25, %v2992_v9 }
 0x11b   : > { %v4193_v39 = vpop.permute.xlu0 %2999  ;;  %v3007_v62 = vunpack.i.h.bf16 %v4191_v46 }
 0x11c   : > { %3294 = vrot.lane.b32.xlu1 %v4181_v13, %s3436_s10  ;;  %v3002_v52 = vunpack.i.h.bf16 %v4193_v39  ;;  %v3001_v38 = vunpack.i.l.bf16 %v4193_v39  ;;  %v3006_v39 = vunpack.i.l.bf16 %v4191_v46  ;;  %v648_v46 = vld [vmem:[#allocation2 + $0x228] sm:$0xff] }
 0x11d   : > { %3289 = vrot.lane.b32.xlu0 %v4095_v32, %s3436_s10  ;;  %v1720_v32 = vsel %vm223_vm0, %v407_v42, %v2966_v5  ;;  %v649_v42 = vld [vmem:[#allocation2 + $0x230] sm:$0xff] }
 0x11e   : > { %v4209_v16 = vpop.permute.xlu1 %3014  ;;  %v1753_v37 = vsel %vm1738_vm3, %v1720_v32, %v2976_v10  ;;  %v1851_v3 = vsel %vm1837_vm6, %v1818_v27, %v3002_v52  ;;  %v3343_v28 = vpack.i.bf16 %v649_v42, %v648_v46 }
 0x11f   : > { %v3010_v48 = vpop.permute.xlu0 %3009  ;;  %v1786_v22 = vsel %vm1771_vm4, %v1753_v37, %v2986_v21  ;;  %v3017_v60 = vunpack.i.h.bf16 %v4209_v16  ;;  %v3016_v4 = vunpack.i.l.bf16 %v4209_v16 }
 0x120   : > { %3304 = vrot.lane.b32.xlu1 %v4199_v55, %s3438_s12  ;;  %v3012_v26 = vunpack.i.h.bf16 %v3010_v48  ;;  %v3011_v54 = vunpack.i.l.bf16 %v3010_v48  ;;  %v1819_v57 = vsel %vm1804_vm5, %v1786_v22, %v2996_v59  ;;  %v1853_v48 = vsel %vm1837_vm6, %v1820_v17, %v3007_v62 }
 0x121   : > { %3299 = vrot.lane.b32.xlu0 %v4099_v49, %s3438_s12  ;;  %v1784_v49 = vsel %vm1771_vm4, %v1751_v47, %v2981_v35  ;;  %v1852_v21 = vsel %vm1837_vm6, %v1819_v57, %v3006_v39  ;;  %v681_v47 = vld [vmem:[#allocation2 + $0x231] sm:$0xff]  ;;  %s216_s12 = scalar_lea.vmem [#allocation3], %s215_s8 }
 0x122   : > { %v3025_v50 = vpop.permute.xlu1 %3024  ;;  %v1817_v41 = vsel %vm1804_vm5, %v1784_v49, %v2991_v61  ;;  %v1884_v56 = vsel %vm1870_vm7, %v1851_v3, %v3012_v26  ;;  %v1885_v35 = vsel %vm1870_vm7, %v1852_v21, %v3016_v4  ;;  %v3353_v31 = vpack.i.bf16 %v681_v47, %v680_v34 }
 0x123   : > { %v3020_v53 = vpop.permute.xlu0 %3019  ;;  %v1850_v2 = vsel %vm1837_vm6, %v1817_v41, %v3001_v38  ;;  %v3027_v11 = vunpack.i.h.bf16 %v3025_v50  ;;  %v3026_v12 = vunpack.i.l.bf16 %v3025_v50  ;;  %v410_v41 = vld [vmem:[#allocation2 + $0x10f] sm:$0xff] }
 0x124   : > { %3314 = vrot.lane.b32.xlu1 %v4211_v20, %s3439_s13  ;;  %v3022_v23 = vunpack.i.h.bf16 %v3020_v53  ;;  %v3021_v14 = vunpack.i.l.bf16 %v3020_v53 }
 0x125   : > { %3309 = vrot.lane.b32.xlu0 %v4157_v30, %s3439_s13  ;;  %v1883_v30 = vsel %vm1870_vm7, %v1850_v2, %v3011_v54  ;;  %v1918_v37 = vsel %vm1903_vm8, %v1885_v35, %v3026_v12  ;;  %v411_v54 = vld [vmem:[#allocation2 + $0x127] sm:$0xff]  ;;  %s2414_s13 = sshll.u32 %s216_s12, 4  ;;  %s4541_s13 = int_to_ptr.vmem [resolvable:$true] %s2414_s13 }
 0x126   : > { %v4249_v1 = vpop.permute.xlu1 %3034  ;;  %v1916_v10 = vsel %vm1903_vm8, %v1883_v30, %v3021_v14  ;;  %v1917_v63 = vsel %vm1903_vm8, %v1884_v56, %v3022_v23  ;;  %v409_v14 = vld [vmem:[#allocation2 + $0x107] sm:$0xff]  ;;  %s3371_s22 = scalar_lea.vmem %s4541_s13, 16  ;;  %p3378_p0 = scmp.lt.s32.totalorder %s4541_s13, %s3376_s25 }
 0x127   : > { %v3030_v5 = vpop.permute.xlu0 %3029  ;;  %v3037_v26 = vunpack.i.h.bf16 %v4249_v1  ;;  %p3372_p11 = scmp.ne.s32.totalorder %s4541_s13, %s3371_s22 }
 0x128   : > { %v3032_v45 = vunpack.i.h.bf16 %v3030_v5  ;;  %v3031_v44 = vunpack.i.l.bf16 %v3030_v5  ;;  %3324 = vrot.lane.b32.xlu1 %v4213_v33, %s3440_s14 }
 0x129   : > { %3319 = vrot.lane.b32.xlu0 %v4181_v13, %s3440_s14  ;;  %v1886_v13 = vsel %vm1870_vm7, %v1853_v48, %v3017_v60  ;;  %p3373_p12 = pnand %p3372_p11, %p3515_p5 }
 0x12a   : > { %v1949_v19 = vsel %vm1936_vm9, %v1916_v10, %v3031_v44  ;;  %v1950_v16 = vsel %vm1936_vm9, %v1917_v63, %v3032_v45  ;;  %v3045_v18 = vpop.permute.xlu1 %3044  ;;  %v1919_v40 = vsel %vm1903_vm8, %v1886_v13, %v3027_v11 }
 0x12b   : > { %v1975_v8 = vpack.c.bf16 %v1950_v16, %v1949_v19  ;;  %v3040_v32 = vpop.permute.xlu0 %3039  ;;  %v3047_v49 = vunpack.i.h.bf16 %v3045_v18  ;;  %v3046_v25 = vunpack.i.l.bf16 %v3045_v18  ;;  %p3374_p13 = pneg %p3373_p12 }
 0x12c   : > { %v3042_v36 = vunpack.i.h.bf16 %v3040_v32  ;;  %v3041_v6 = vunpack.i.l.bf16 %v3040_v32  ;;  %3334 = vrot.lane.b32.xlu1 %v3333_v43, %s3442_s15 }
 0x12d   : > { %3329 = vrot.lane.b32.xlu0 %v4199_v55, %s3442_s15  ;;  %2628 = vmatprep.mubr.msk.bf16.mxu0 %vm2007_vm10, %v1975_v8  ;;  %v1725_v60 = vsel %vm223_vm0, %v412_v58, %v3047_v49  ;;  %v1724_v4 = vsel %vm223_vm0, %v411_v54, %v3046_v25 }
 0x12e   : > { %v1952_v9 = vsel %vm1936_vm9, %v1919_v40, %v3042_v36  ;;  %v1951_v61 = vsel %vm1936_vm9, %v1918_v37, %v3041_v6  ;;  %v3055_v50 = vpop.permute.xlu1 %3054 }
 0x12f   : > { %v1976_v22 = vpack.c.bf16 %v1952_v9, %v1951_v61  ;;  %v3050_v51 = vpop.permute.xlu0 %3049  ;;  %v3057_v59 = vunpack.i.h.bf16 %v3055_v50  ;;  %v3056_v23 = vunpack.i.l.bf16 %v3055_v50 }
 0x130   : > { %3344 = vrot.lane.b32.xlu1 %v3343_v28, %s3443_s26  ;;  %v3052_v27 = vunpack.i.h.bf16 %v3050_v51 }
 0x131   : > { %3339 = vrot.lane.b32.xlu0 %v4211_v20, %s3443_s26  ;;  %2629 = vmatmul.mubr.msk.bf16.gmra.mrb[12].mxu0 %vm2007_vm10, %v1976_v22  ;;  %v3036_v20 = vunpack.i.l.bf16 %v4249_v1  ;;  %v1723_v1 = vsel %vm223_vm0, %v410_v41, %v3037_v26  ;;  %v1757_v45 = vsel %vm1738_vm3, %v1724_v4, %v3056_v23  ;;  %v1758_v44 = vsel %vm1738_vm3, %v1725_v60, %v3057_v59  ;;  %s3377_s26 = scalar_lea.vmem %s3376_s25, 32 }
 0x132   : > { %v3065_v55 = vpop.permute.xlu1 %3064  ;;  %v1756_v46 = vsel %vm1738_vm3, %v1723_v1, %v3052_v27  ;;  %p3379_p1 = scmp.lt.s32.totalorder %s3377_s26, %s3371_s22 }
 0x133   : > { %v3060_v7 = vpop.permute.xlu0 %3059  ;;  %v3067_v39 = vunpack.i.h.bf16 %v3065_v55  ;;  %v3066_v2 = vunpack.i.l.bf16 %v3065_v55  ;;  %v1722_v56 = vsel %vm223_vm0, %v409_v14, %v3036_v20 }
 0x134   : > { %3354 = vrot.lane.b32.xlu1 %v3353_v31, %s3444_s30  ;;  %v3062_v5 = vunpack.i.h.bf16 %v3060_v7  ;;  %v3061_v30 = vunpack.i.l.bf16 %v3060_v7  ;;  %p3380_p2 = por %p3379_p1, %p3378_p0 }
 0x135   : > { %3349 = vrot.lane.b32.xlu0 %v4213_v33, %s3444_s30  ;;  %v3051_v33 = vunpack.i.l.bf16 %v3050_v51  ;;  %v1790_v63 = vsel %vm1771_vm4, %v1757_v45, %v3066_v2  ;;  %v1791_v57 = vsel %vm1771_vm4, %v1758_v44, %v3067_v39 }
 0x136   : > { %v4289_v43 = vpop.permute.xlu1 %3074  ;;  %v1789_v21 = vsel %vm1771_vm4, %v1756_v46, %v3062_v5  ;;  %p3381_p3 = pnand %p3380_p2, %p3374_p13 }
 0x137   : > { %v3070_v52 = vpop.permute.xlu0 %3069  ;;  %v1755_v42 = vsel %vm1738_vm3, %v1722_v56, %v3051_v33  ;;  %v3077_v32 = vunpack.i.h.bf16 %v4289_v43  ;;  %v3076_v28 = vunpack.i.l.bf16 %v4289_v43 }
 0x138   : > { %v3072_v11 = vunpack.i.h.bf16 %v3070_v52  ;;  %v3071_v12 = vunpack.i.l.bf16 %v3070_v52  ;;  %v1788_v18 = vsel %vm1771_vm4, %v1755_v42, %v3061_v30 }
 0x139   : > { %v1823_v49 = vsel %vm1804_vm5, %v1790_v63, %v3076_v28  ;;  %v1824_v25 = vsel %vm1804_vm5, %v1791_v57, %v3077_v32  ;;  %v415_v57 = vld [vmem:[#allocation2 + $0x167] sm:$0xff] }
 0x13a   : > { %v4291_v38 = vpop.permute.xlu1 %3084  ;;  %v1821_v36 = vsel %vm1804_vm5, %v1788_v18, %v3071_v12  ;;  %v1822_v6 = vsel %vm1804_vm5, %v1789_v21, %v3072_v11  ;;  %v413_v18 = vld [vmem:[#allocation2 + $0x147] sm:$0xff]  ;;  %v414_v21 = vld [vmem:[#allocation2 + $0x14f] sm:$0xff] }
 0x13b   : > { %v3080_v53 = vpop.permute.xlu0 %3079  ;;  %v3087_v37 = vunpack.i.h.bf16 %v4291_v38  ;;  %v3086_v40 = vunpack.i.l.bf16 %v4291_v38 }
 0x13c   : > { %v3082_v17 = vunpack.i.h.bf16 %v3080_v53  ;;  %v3081_v19 = vunpack.i.l.bf16 %v3080_v53 }
 0x13d   : > { %v1856_v58 = vsel %vm1837_vm6, %v1823_v49, %v3086_v40  ;;  %v1857_v59 = vsel %vm1837_vm6, %v1824_v25, %v3087_v37 }
 0x13e   : > { %v3095_v62 = vpop.permute.xlu1 %3094  ;;  %v1854_v47 = vsel %vm1837_vm6, %v1821_v36, %v3081_v19  ;;  %v1855_v9 = vsel %vm1837_vm6, %v1822_v6, %v3082_v17  ;;  %v416_v17 = vld [vmem:[#allocation2 + $0x16f] sm:$0xff] }
 0x13f   : > { %v3090_v3 = vpop.permute.xlu0 %3089  ;;  %v3097_v61 = vunpack.i.h.bf16 %v3095_v62  ;;  %v3096_v50 = vunpack.i.l.bf16 %v3095_v62 }
 0x140   : > { %v3092_v48 = vunpack.i.h.bf16 %v3090_v3  ;;  %v3091_v8 = vunpack.i.l.bf16 %v3090_v3 }
 0x141   : > { %v1889_v41 = vsel %vm1870_vm7, %v1856_v58, %v3096_v50  ;;  %v1890_v27 = vsel %vm1870_vm7, %v1857_v59, %v3097_v61 }
 0x142   : > { %v3105_v10 = vpop.permute.xlu1 %3104  ;;  %v1887_v51 = vsel %vm1870_vm7, %v1854_v47, %v3091_v8  ;;  %v1888_v31 = vsel %vm1870_vm7, %v1855_v9, %v3092_v48 }
 0x143   : > { %v3100_v16 = vpop.permute.xlu0 %3099  ;;  %v3107_v43 = vunpack.i.h.bf16 %v3105_v10  ;;  %v3106_v52 = vunpack.i.l.bf16 %v3105_v10 }
 0x144   : > { %v3102_v35 = vunpack.i.h.bf16 %v3100_v16  ;;  %v3101_v13 = vunpack.i.l.bf16 %v3100_v16 }
 0x145   : > { %v1922_v39 = vsel %vm1903_vm8, %v1889_v41, %v3106_v52  ;;  %v1923_v2 = vsel %vm1903_vm8, %v1890_v27, %v3107_v43 }
 0x146   : > { %v4313_v34 = vpop.permute.xlu1 %3114  ;;  %v1920_v53 = vsel %vm1903_vm8, %v1887_v51, %v3101_v13  ;;  %v1921_v38 = vsel %vm1903_vm8, %v1888_v31, %v3102_v35 }
 0x147   : > { %v3110_v22 = vpop.permute.xlu0 %3109  ;;  %v3117_v10 = vunpack.i.h.bf16 %v4313_v34  ;;  %v3116_v63 = vunpack.i.l.bf16 %v4313_v34 }
 0x148   : > { %v3112_v55 = vunpack.i.h.bf16 %v3110_v22  ;;  %v3111_v7 = vunpack.i.l.bf16 %v3110_v22 }
 0x149   : > { %v1727_v34 = vsel %vm223_vm0, %v414_v21, %v3117_v10  ;;  %v1726_v47 = vsel %vm223_vm0, %v413_v18, %v3116_v63 }
 0x14a   : > { %v1953_v26 = vsel %vm1936_vm9, %v1920_v53, %v3111_v7  ;;  %v1954_v20 = vsel %vm1936_vm9, %v1921_v38, %v3112_v55  ;;  %v3125_v54 = vpop.permute.xlu1 %3124 }
 0x14b   : > { %v1977_v23 = vpack.c.bf16 %v1954_v20, %v1953_v26  ;;  %v3120_v14 = vpop.permute.xlu0 %3119  ;;  %v3127_v11 = vunpack.i.h.bf16 %v3125_v54  ;;  %v3126_v12 = vunpack.i.l.bf16 %v3125_v54 }
 0x14c   : > { %v3122_v33 = vunpack.i.h.bf16 %v3120_v14  ;;  %v3121_v62 = vunpack.i.l.bf16 %v3120_v14 }
 0x14d   : > { %2632 = vmatprep.mubr.msk.bf16.mxu0 %vm2007_vm10, %v1977_v23  ;;  %v1729_v36 = vsel %vm223_vm0, %v416_v17, %v3127_v11  ;;  %v1728_v6 = vsel %vm223_vm0, %v415_v57, %v3126_v12 }
 0x14e   : > { %v1956_v3 = vsel %vm1936_vm9, %v1923_v2, %v3122_v33  ;;  %v1955_v60 = vsel %vm1936_vm9, %v1922_v39, %v3121_v62  ;;  %v3135_v4 = vpop.permute.xlu1 %3134 }
 0x14f   : > { %v1978_v5 = vpack.c.bf16 %v1956_v3, %v1955_v60  ;;  %v3130_v30 = vpop.permute.xlu0 %3129  ;;  %v3137_v19 = vunpack.i.h.bf16 %v3135_v4  ;;  %v3136_v16 = vunpack.i.l.bf16 %v3135_v4 }
 0x150   : > { %v3132_v48 = vunpack.i.h.bf16 %v3130_v30  ;;  %v3131_v8 = vunpack.i.l.bf16 %v3130_v30 }
 0x151   : > { %2633 = vmatmul.mubr.msk.bf16.gmra.mrb[16].mxu0 %vm2007_vm10, %v1978_v5  ;;  %v1761_v9 = vsel %vm1738_vm3, %v1728_v6, %v3136_v16  ;;  %v1762_v61 = vsel %vm1738_vm3, %v1729_v36, %v3137_v19 }
 0x152   : > { %v3145_v1 = vpop.permute.xlu1 %3144  ;;  %v1760_v50 = vsel %vm1738_vm3, %v1727_v34, %v3132_v48  ;;  %v1759_v22 = vsel %vm1738_vm3, %v1726_v47, %v3131_v8 }
 0x153   : > { %v3140_v56 = vpop.permute.xlu0 %3139  ;;  %v3147_v28 = vunpack.i.h.bf16 %v3145_v1  ;;  %v3146_v35 = vunpack.i.l.bf16 %v3145_v1 }
 0x154   : > { %v3142_v37 = vunpack.i.h.bf16 %v3140_v56  ;;  %v3141_v40 = vunpack.i.l.bf16 %v3140_v56 }
 0x155   : > { %v1794_v7 = vsel %vm1771_vm4, %v1761_v9, %v3146_v35  ;;  %v1795_v43 = vsel %vm1771_vm4, %v1762_v61, %v3147_v28 }
 0x156   : > { %v4335_v45 = vpop.permute.xlu1 %3154  ;;  %v1792_v49 = vsel %vm1771_vm4, %v1759_v22, %v3141_v40  ;;  %v1793_v25 = vsel %vm1771_vm4, %v1760_v50, %v3142_v37 }
 0x157   : > { %v3150_v44 = vpop.permute.xlu0 %3149  ;;  %v3157_v54 = vunpack.i.h.bf16 %v4335_v45  ;;  %v3156_v58 = vunpack.i.l.bf16 %v4335_v45 }
 0x158   : > { %v3152_v51 = vunpack.i.h.bf16 %v3150_v44  ;;  %v3151_v31 = vunpack.i.l.bf16 %v3150_v44 }
 0x159   : > { %v1827_v11 = vsel %vm1804_vm5, %v1794_v7, %v3156_v58  ;;  %v1828_v12 = vsel %vm1804_vm5, %v1795_v43, %v3157_v54 }
 0x15a   : > { %v4337_v46 = vpop.permute.xlu1 %3164  ;;  %v1825_v14 = vsel %vm1804_vm5, %v1792_v49, %v3151_v31  ;;  %v1826_v41 = vsel %vm1804_vm5, %v1793_v25, %v3152_v51 }
 0x15b   : > { %v3160_v42 = vpop.permute.xlu0 %3159  ;;  %v3167_v27 = vunpack.i.h.bf16 %v4337_v46  ;;  %v3166_v33 = vunpack.i.l.bf16 %v4337_v46 }
 0x15c   : > { %v3162_v52 = vunpack.i.h.bf16 %v3160_v42  ;;  %v3161_v53 = vunpack.i.l.bf16 %v3160_v42 }
 0x15d   : > { %v1860_v17 = vsel %vm1837_vm6, %v1827_v11, %v3166_v33  ;;  %v1861_v19 = vsel %vm1837_vm6, %v1828_v12, %v3167_v27 }
 0x15e   : > { %v3175_v32 = vpop.permute.xlu1 %3174  ;;  %v1858_v39 = vsel %vm1837_vm6, %v1825_v14, %v3161_v53  ;;  %v1859_v2 = vsel %vm1837_vm6, %v1826_v41, %v3162_v52  ;;  %v417_v53 = vld [vmem:[#allocation2 + $0x187] sm:$0xff] }
 0x15f   : > { %v3170_v13 = vpop.permute.xlu0 %3169  ;;  %v3177_v3 = vunpack.i.h.bf16 %v3175_v32  ;;  %v3176_v60 = vunpack.i.l.bf16 %v3175_v32  ;;  %v3369_v14 = vld [vmem:[#allocation2 + $0x1a7] sm:$0xff] }
 0x160   : > { %v3172_v26 = vunpack.i.h.bf16 %v3170_v13  ;;  %v3171_v20 = vunpack.i.l.bf16 %v3170_v13 }
 0x161   : > { %v1893_v21 = vsel %vm1870_vm7, %v1860_v17, %v3176_v60  ;;  %v1894_v48 = vsel %vm1870_vm7, %v1861_v19, %v3177_v3 }
 0x162   : > { %v3185_v55 = vpop.permute.xlu1 %3184  ;;  %v1891_v5 = vsel %vm1870_vm7, %v1858_v39, %v3171_v20  ;;  %v1892_v30 = vsel %vm1870_vm7, %v1859_v2, %v3172_v26 }
 0x163   : > { %v3180_v38 = vpop.permute.xlu0 %3179  ;;  %v3187_v45 = vunpack.i.h.bf16 %v3185_v55  ;;  %v3186_v44 = vunpack.i.l.bf16 %v3185_v55 }
 0x164   : > { %v3182_v59 = vunpack.i.h.bf16 %v3180_v38  ;;  %v3181_v23 = vunpack.i.l.bf16 %v3180_v38  ;;  %v418_v38 = vld [vmem:[#allocation2 + $0x18f] sm:$0xff] }
 0x165   : > { %v1926_v28 = vsel %vm1903_vm8, %v1893_v21, %v3186_v44  ;;  %v1927_v35 = vsel %vm1903_vm8, %v1894_v48, %v3187_v45 }
 0x166   : > { %v4359_v62 = vpop.permute.xlu1 %3194  ;;  %v1924_v42 = vsel %vm1903_vm8, %v1891_v5, %v3181_v23  ;;  %v1925_v46 = vsel %vm1903_vm8, %v1892_v30, %v3182_v59  ;;  %v3368_v59 = vld [vmem:[#allocation2 + $0x1af] sm:$0xff] }
 0x167   : > { %v3190_v4 = vpop.permute.xlu0 %3189  ;;  %v3197_v55 = vunpack.i.h.bf16 %v4359_v62  ;;  %v3196_v7 = vunpack.i.l.bf16 %v4359_v62 }
 0x168   : > { %v3192_v1 = vunpack.i.h.bf16 %v3190_v4  ;;  %v3191_v56 = vunpack.i.l.bf16 %v3190_v4 }
 0x169   : > { %v1731_v62 = vsel %vm223_vm0, %v418_v38, %v3197_v55  ;;  %v1730_v39 = vsel %vm223_vm0, %v417_v53, %v3196_v7 }
 0x16a   : > { %v1957_v10 = vsel %vm1936_vm9, %v1924_v42, %v3191_v56  ;;  %v1958_v63 = vsel %vm1936_vm9, %v1925_v46, %v3192_v1  ;;  %v3205_v57 = vpop.permute.xlu1 %3204 }
 0x16b   : > { %v1979_v16 = vpack.c.bf16 %v1958_v63, %v1957_v10  ;;  %v3200_v18 = vpop.permute.xlu0 %3199  ;;  %v3207_v51 = vunpack.i.h.bf16 %v3205_v57  ;;  %v3206_v31 = vunpack.i.l.bf16 %v3205_v57 }
 0x16c   : > { %v3202_v8 = vunpack.i.h.bf16 %v3200_v18  ;;  %v3201_v32 = vunpack.i.l.bf16 %v3200_v18 }
 0x16d   : > { %2636 = vmatprep.mubr.msk.bf16.mxu0 %vm2007_vm10, %v1979_v16  ;;  %v1733_v23 = vsel %vm223_vm0, %v3368_v59, %v3207_v51  ;;  %v1732_v41 = vsel %vm223_vm0, %v3369_v14, %v3206_v31 }
 0x16e   : > { %v1960_v13 = vsel %vm1936_vm9, %v1927_v35, %v3202_v8  ;;  %v1959_v36 = vsel %vm1936_vm9, %v1926_v28, %v3201_v32  ;;  %v3215_v6 = vpop.permute.xlu1 %3214 }
 0x16f   : > { %v1980_v37 = vpack.c.bf16 %v1960_v13, %v1959_v36  ;;  %v3210_v40 = vpop.permute.xlu0 %3209  ;;  %v3217_v43 = vunpack.i.h.bf16 %v3215_v6  ;;  %v3216_v52 = vunpack.i.l.bf16 %v3215_v6 }
 0x170   : > { %v3212_v49 = vunpack.i.h.bf16 %v3210_v40  ;;  %v3211_v25 = vunpack.i.l.bf16 %v3210_v40 }
 0x171   : > { %2637 = vmatmul.mubr.msk.bf16.gmra.mrb[20].mxu0 %vm2007_vm10, %v1980_v37  ;;  %v1765_v2 = vsel %vm1738_vm3, %v1732_v41, %v3216_v52  ;;  %v1766_v3 = vsel %vm1738_vm3, %v1733_v23, %v3217_v43 }
 0x172   : > { %v3225_v34 = vpop.permute.xlu1 %3224  ;;  %v1764_v60 = vsel %vm1738_vm3, %v1731_v62, %v3212_v49  ;;  %v1763_v4 = vsel %vm1738_vm3, %v1730_v39, %v3211_v25 }
 0x173   : > { %v3220_v47 = vpop.permute.xlu0 %3219  ;;  %v3227_v20 = vunpack.i.h.bf16 %v3225_v34  ;;  %v3226_v54 = vunpack.i.l.bf16 %v3225_v34 }
 0x174   : > { %v3222_v27 = vunpack.i.h.bf16 %v3220_v47  ;;  %v3221_v33 = vunpack.i.l.bf16 %v3220_v47 }
 0x175   : > { %v1798_v56 = vsel %vm1771_vm4, %v1765_v2, %v3226_v54  ;;  %v1799_v45 = vsel %vm1771_vm4, %v1766_v3, %v3227_v20 }
 0x176   : > { %v4381_v9 = vpop.permute.xlu1 %3234  ;;  %v1796_v11 = vsel %vm1771_vm4, %v1763_v4, %v3221_v33  ;;  %v1797_v12 = vsel %vm1771_vm4, %v1764_v60, %v3222_v27 }
 0x177   : > { %v3230_v61 = vpop.permute.xlu0 %3229  ;;  %v3237_v57 = vunpack.i.h.bf16 %v4381_v9  ;;  %v3236_v17 = vunpack.i.l.bf16 %v4381_v9 }
 0x178   : > { %v3232_v5 = vunpack.i.h.bf16 %v3230_v61  ;;  %v3231_v30 = vunpack.i.l.bf16 %v3230_v61 }
 0x179   : > { %v1831_v51 = vsel %vm1804_vm5, %v1798_v56, %v3236_v17  ;;  %v1832_v31 = vsel %vm1804_vm5, %v1799_v45, %v3237_v57 }
 0x17a   : > { %v4383_v50 = vpop.permute.xlu1 %3244  ;;  %v1829_v18 = vsel %vm1804_vm5, %v1796_v11, %v3231_v30  ;;  %v1830_v21 = vsel %vm1804_vm5, %v1797_v12, %v3232_v5 }
 0x17b   : > { %v3240_v22 = vpop.permute.xlu0 %3239  ;;  %v3247_v48 = vunpack.i.h.bf16 %v4383_v50  ;;  %v3246_v8 = vunpack.i.l.bf16 %v4383_v50 }
 0x17c   : > { %v3242_v44 = vunpack.i.h.bf16 %v3240_v22  ;;  %v3241_v42 = vunpack.i.l.bf16 %v3240_v22 }
 0x17d   : > { %v1864_v52 = vsel %vm1837_vm6, %v1831_v51, %v3246_v8  ;;  %v1865_v53 = vsel %vm1837_vm6, %v1832_v31, %v3247_v48 }
 0x17e   : > { %v3255_v26 = vpop.permute.xlu1 %3254  ;;  %v1862_v28 = vsel %vm1837_vm6, %v1829_v18, %v3241_v42  ;;  %v1863_v35 = vsel %vm1837_vm6, %v1830_v21, %v3242_v44 }
 0x17f   : > { %v3250_v58 = vpop.permute.xlu0 %3249  ;;  %v3257_v13 = vunpack.i.h.bf16 %v3255_v26  ;;  %v3256_v36 = vunpack.i.l.bf16 %v3255_v26 }
 0x180   : > { %v3252_v10 = vunpack.i.h.bf16 %v3250_v58  ;;  %v3251_v63 = vunpack.i.l.bf16 %v3250_v58 }
 0x181   : > { %v1897_v25 = vsel %vm1870_vm7, %v1864_v52, %v3256_v36  ;;  %v1898_v26 = vsel %vm1870_vm7, %v1865_v53, %v3257_v13 }
 0x182   : > { %v3265_v1 = vpop.permute.xlu1 %3264  ;;  %v1895_v37 = vsel %vm1870_vm7, %v1862_v28, %v3251_v63  ;;  %v1896_v40 = vsel %vm1870_vm7, %v1863_v35, %v3252_v10 }
 0x183   : > { %v3260_v46 = vpop.permute.xlu0 %3259  ;;  %v3267_v9 = vunpack.i.h.bf16 %v3265_v1  ;;  %v3266_v61 = vunpack.i.l.bf16 %v3265_v1 }
 0x184   : > { %v3262_v19 = vunpack.i.h.bf16 %v3260_v46  ;;  %v3261_v16 = vunpack.i.l.bf16 %v3260_v46 }
 0x185   : > { %v1930_v58 = vsel %vm1903_vm8, %v1897_v25, %v3266_v61  ;;  %v1931_v59 = vsel %vm1903_vm8, %v1898_v26, %v3267_v9 }
 0x186   : > { %v3275_v32 = vpop.permute.xlu1 %3274  ;;  %v1928_v22 = vsel %vm1903_vm8, %v1895_v37, %v3261_v16  ;;  %v1929_v50 = vsel %vm1903_vm8, %v1896_v40, %v3262_v19  ;;  %v3370_v16 = vld [vmem:[#allocation2 + $0x1c7] sm:$0xff] }
 0x187   : > { %v3270_v6 = vpop.permute.xlu0 %3269  ;;  %v3277_v3 = vunpack.i.h.bf16 %v3275_v32  ;;  %v3276_v30 = vunpack.i.l.bf16 %v3275_v32 }
 0x188   : > { %v3272_v34 = vunpack.i.h.bf16 %v3270_v6  ;;  %v3271_v47 = vunpack.i.l.bf16 %v3270_v6 }
 0x189   : > { %v1735_v46 = vsel %vm223_vm0, %v4070_v15, %v3277_v3  ;;  %v1734_v18 = vsel %vm223_vm0, %v3370_v16, %v3276_v30 }
 0x18a   : > { %v1961_v55 = vsel %vm1936_vm9, %v1928_v22, %v3271_v47  ;;  %v1962_v7 = vsel %vm1936_vm9, %v1929_v50, %v3272_v34  ;;  %v3285_v43 = vpop.permute.xlu1 %3284 }
 0x18b   : > { %v1981_v38 = vpack.c.bf16 %v1962_v7, %v1961_v55  ;;  %v3280_v49 = vpop.permute.xlu0 %3279  ;;  %v3287_v4 = vunpack.i.h.bf16 %v3285_v43  ;;  %v3286_v5 = vunpack.i.l.bf16 %v3285_v43 }
 0x18c   : > { %v3282_v20 = vunpack.i.h.bf16 %v3280_v49  ;;  %v3281_v54 = vunpack.i.l.bf16 %v3280_v49 }
 0x18d   : > { %2640 = vmatprep.mubr.msk.bf16.mxu0 %vm2007_vm10, %v1981_v38  ;;  %v1737_v63 = vsel %vm223_vm0, %v4085_v29, %v3287_v4  ;;  %v1736_v57 = vsel %vm223_vm0, %v4083_v24, %v3286_v5 }
 0x18e   : > { %v1964_v23 = vsel %vm1936_vm9, %v1931_v59, %v3282_v20  ;;  %v1963_v14 = vsel %vm1936_vm9, %v1930_v58, %v3281_v54  ;;  %v3295_v41 = vpop.permute.xlu1 %3294  ;;  %v4448_v20 = vld [vmem:[%s4583_s2] ss:$0 sm:$0xff] }
 0x18f   : > { %v1982_v27 = vpack.c.bf16 %v1964_v23, %v1963_v14  ;;  %v3290_v33 = vpop.permute.xlu0 %3289  ;;  %v3297_v1 = vunpack.i.h.bf16 %v3295_v41  ;;  %v3296_v56 = vunpack.i.l.bf16 %v3295_v41 }
 0x190   : > { %v3292_v45 = vunpack.i.h.bf16 %v3290_v33  ;;  %v3291_v44 = vunpack.i.l.bf16 %v3290_v33 }
 0x191   : > { %2641 = vmatmul.mubr.msk.bf16.gmra.mrb[24].mxu0 %vm2007_vm10, %v1982_v27  ;;  %v1769_v21 = vsel %vm1738_vm3, %v1736_v57, %v3296_v56  ;;  %v1770_v48 = vsel %vm1738_vm3, %v1737_v63, %v3297_v1 }
 0x192   : > { %v3305_v62 = vpop.permute.xlu1 %3304  ;;  %v1768_v15 = vsel %vm1738_vm3, %v1735_v46, %v3292_v45  ;;  %v1767_v8 = vsel %vm1738_vm3, %v1734_v18, %v3291_v44 }
 0x193   : > { %v3300_v39 = vpop.permute.xlu0 %3299  ;;  %v3307_v11 = vunpack.i.h.bf16 %v3305_v62  ;;  %v3306_v12 = vunpack.i.l.bf16 %v3305_v62 }
 0x194   : > { %v3302_v17 = vunpack.i.h.bf16 %v3300_v39  ;;  %v3301_v19 = vunpack.i.l.bf16 %v3300_v39 }
 0x195   : > { %v1802_v13 = vsel %vm1771_vm4, %v1769_v21, %v3306_v12  ;;  %v1803_v24 = vsel %vm1771_vm4, %v1770_v48, %v3307_v11 }
 0x196   : > { %v3315_v2 = vpop.permute.xlu1 %3314  ;;  %v1800_v40 = vsel %vm1771_vm4, %v1767_v8, %v3301_v19  ;;  %v1801_v34 = vsel %vm1771_vm4, %v1768_v15, %v3302_v17 }
 0x197   : > { %v3310_v60 = vpop.permute.xlu0 %3309  ;;  %v3317_v32 = vunpack.i.h.bf16 %v3315_v2  ;;  %v3316_v28 = vunpack.i.l.bf16 %v3315_v2 }
 0x198   : > { %v3311_v35 = vunpack.i.l.bf16 %v3310_v60  ;;  %v3312_v36 = vunpack.i.h.bf16 %v3310_v60 }
 0x199   : > { %v1835_v31 = vsel %vm1804_vm5, %v1802_v13, %v3316_v28  ;;  %v1836_v55 = vsel %vm1804_vm5, %v1803_v24, %v3317_v32 }
 0x19a   : > { %v3325_v42 = vpop.permute.xlu1 %3324  ;;  %v1833_v7 = vsel %vm1804_vm5, %v1800_v40, %v3311_v35  ;;  %v1834_v53 = vsel %vm1804_vm5, %v1801_v34, %v3312_v36 }
 0x19b   : > { %v3320_v10 = vpop.permute.xlu0 %3319  ;;  %v3326_v6 = vunpack.i.l.bf16 %v3325_v42  ;;  %v3327_v47 = vunpack.i.h.bf16 %v3325_v42 }
 0x19c   : > { %v3321_v9 = vunpack.i.l.bf16 %v3320_v10  ;;  %v3322_v61 = vunpack.i.h.bf16 %v3320_v10 }
 0x19d   : > { %v1868_v38 = vsel %vm1837_vm6, %v1835_v31, %v3326_v6  ;;  %v1869_v54 = vsel %vm1837_vm6, %v1836_v55, %v3327_v47 }
 0x19e   : > { %v3335_v29 = vpop.permute.xlu1 %3334  ;;  %v1866_v58 = vsel %vm1837_vm6, %v1833_v7, %v3321_v9  ;;  %v1867_v41 = vsel %vm1837_vm6, %v1834_v53, %v3322_v61 }
 0x19f   : > { %v3330_v37 = vpop.permute.xlu0 %3329  ;;  %v3337_v22 = vunpack.i.h.bf16 %v3335_v29  ;;  %v3336_v50 = vunpack.i.l.bf16 %v3335_v29 }
 0x1a0   : > { %v3331_v51 = vunpack.i.l.bf16 %v3330_v37  ;;  %v3332_v43 = vunpack.i.h.bf16 %v3330_v37 }
 0x1a1   : > { %v1901_v27 = vsel %vm1870_vm7, %v1868_v38, %v3336_v50  ;;  %v1902_v33 = vsel %vm1870_vm7, %v1869_v54, %v3337_v22 }
 0x1a2   : > { %v3345_v52 = vpop.permute.xlu1 %3344  ;;  %v1899_v62 = vsel %vm1870_vm7, %v1866_v58, %v3331_v51  ;;  %v1900_v2 = vsel %vm1870_vm7, %v1867_v41, %v3332_v43 }
 0x1a3   : > { %v3347_v49 = vunpack.i.h.bf16 %v3345_v52  ;;  %v3346_v25 = vunpack.i.l.bf16 %v3345_v52  ;;  %v3340_v26 = vpop.permute.xlu0 %3339 }
 0x1a4   : > { %v3342_v59 = vunpack.i.h.bf16 %v3340_v26  ;;  %v3341_v23 = vunpack.i.l.bf16 %v3340_v26  ;;  %v2618_v14 = vpop.f32.mrb[0].mxu0 }
 0x1a5   : > { %v2097_v39 = vpop.f32.mrb[1].mxu0  ;;  %v1934_v3 = vsel %vm1903_vm8, %v1901_v27, %v3346_v25  ;;  %v1935_v60 = vsel %vm1903_vm8, %v1902_v33, %v3347_v49  ;;  %v2106_v56 = vadd.f32 %v2618_v14, %v4448_v20 }
 0x1a6   : > { %v2098_v4 = vadd.f32 %v4448_v20, %v2097_v39  ;;  %v2619_v5 = vpop.f32.mrb[2].mxu0  ;;  %v3355_v30 = vpop.permute.xlu1 %3354  ;;  %v1932_v1 = vsel %vm1903_vm8, %v1899_v62, %v3341_v23  ;;  %v1933_v11 = vsel %vm1903_vm8, %v1900_v2, %v3342_v59  ;;  %v3360_v39 = vld [vmem:[%s4584_s3] sm:$0xff]  }
 0x1a7   : > { %v3357_v45 = vunpack.i.h.bf16 %v3355_v30  ;;  %v3356_v44 = vunpack.i.l.bf16 %v3355_v30  ;;  %v3350_v42 = vpop.permute.xlu0 %3349  ;;  %v2100_v46 = vpop.f32.mrb[3].mxu0  ;;  %v2109_v17 = vadd.f32 %v2619_v5, %v4448_v20  ;;  %v2226_v32 = vmax.f32 %v2106_v56, 0.0  ;;  %2649 = vmatpush3.bf16.msra.mxu1 %v3360_v39 }
 0x1a8   : > { %v3352_v12 = vunpack.i.h.bf16 %v3350_v42  ;;  %v3351_v10 = vunpack.i.l.bf16 %v3350_v42  ;;  %v2101_v63 = vadd.f32 %v4448_v20, %v2100_v46  ;;  %v2224_v57 = vmax.f32 %v2098_v4, 0.0  ;;  %2650 = vmatprep.subr.bf16.mxu1 %v3435_v0 }
 0x1a9   : > { %v1967_v19 = vsel %vm1936_vm9, %v1934_v3, %v3356_v44  ;;  %v1968_v16 = vsel %vm1936_vm9, %v1935_v60, %v3357_v45  ;;  %v2227_v35 = vmax.f32 %v2109_v17, 0.0  ;;  %v3361_v3 = vld [vmem:[%s4584_s3 + $0x8] sm:$0xff]  }
 0x1aa   : > { %v1984_v18 = vpack.c.bf16 %v1968_v16, %v1967_v19  ;;  %v1965_v21 = vsel %vm1936_vm9, %v1932_v1, %v3351_v10  ;;  %v1966_v48 = vsel %vm1936_vm9, %v1933_v11, %v3352_v12  ;;  %v2225_v15 = vmax.f32 %v2101_v63, 0.0  ;;  %v3362_v1 = vld [vmem:[%s4584_s3 + $0x10] sm:$0xff]   ;;  %v3363_v10 = vld [vmem:[%s4584_s3 + $0x18] sm:$0xff]   ;;  %v3364_v16 = vld [vmem:[%s4584_s3 + $0x20] sm:$0xff]  }
 0x1ab   : > { %v1983_v8 = vpack.c.bf16 %v1966_v48, %v1965_v21  ;;  %2651 = vmatpush3.bf16.msra.mxu1 %v3361_v3  ;;  %v3365_v21 = vld [vmem:[%s4584_s3 + $0x28] sm:$0xff]   ;;  %v3366_v48 = vld [vmem:[%s4584_s3 + $0x30] sm:$0xff]  }
 0x1ac   : > { %v2256_v28 = vadd.f32 %v2225_v15, %v2224_v57  ;;  %2652 = vmatprep.subr.bf16.mxu1 %v3435_v0  ;;  %v3367_v15 = vld [vmem:[%s4584_s3 + $0x38] sm:$0xff]  }
 0x1ad   : > { %2644 = vmatprep.mubr.msk.bf16.mxu0 %vm2007_vm10, %v1983_v8 }
 0x1ae   : > { %v2257_v29 = vadd.f32 %v2256_v28, %v2226_v32  ;;  %2645 = vmatmul.mubr.msk.bf16.gmra.mrb[28].mxu0 %vm2007_vm10, %v1984_v18 }
 0x1af   : > { %2653 = vmatpush3.bf16.msra.mxu1 %v3362_v1 }
 0x1b0   : > { %v2258_v13 = vadd.f32 %v2257_v29, %v2227_v35  ;;  %2654 = vmatprep.subr.bf16.mxu1 %v3435_v0 }
 0x1b3   : > { %2655 = vmatpush3.bf16.msra.mxu1 %v3363_v10 }
 0x1b4   : > { %2656 = vmatprep.subr.bf16.mxu1 %v3435_v0 }
 0x1b7   : > { %2657 = vmatpush3.bf16.msra.mxu1 %v3364_v16 }
 0x1b8   : > { %2658 = vmatprep.subr.bf16.mxu1 %v3435_v0 }
 0x1bb   : > { %2659 = vmatpush3.bf16.msra.mxu1 %v3365_v21 }
 0x1bc   : > { %2660 = vmatprep.subr.bf16.mxu1 %v3435_v0 }
 0x1bf   : > { %2661 = vmatpush3.bf16.msra.mxu1 %v3366_v48 }
 0x1c0   : > { %2662 = vmatprep.subr.bf16.mxu1 %v3435_v0 }
 0x1c3   : > { %2663 = vmatpush3.bf16.msra.mxu1 %v3367_v15 }
 0x1c4   : > { %v2622_v24 = vpop.f32.mrb[4].mxu0 }
 0x1c5   : > { %v2113_v36 = vpop.f32.mrb[5].mxu0  ;;  %v2122_v34 = vadd.f32 %v2622_v24, %v4448_v20 }
 0x1c6   : > { %v2114_v6 = vadd.f32 %v4448_v20, %v2113_v36  ;;  %v2623_v37 = vpop.f32.mrb[6].mxu0 }
 0x1c7   : > { %v2116_v40 = vpop.f32.mrb[7].mxu0  ;;  %v2125_v22 = vadd.f32 %v2623_v37, %v4448_v20  ;;  %v2230_v51 = vmax.f32 %v2122_v34, 0.0 }
 0x1c8   : > { %v2228_v47 = vmax.f32 %v2114_v6, 0.0  ;;  %v2117_v9 = vadd.f32 %v4448_v20, %v2116_v40 }
 0x1c9   : > { %v2231_v55 = vmax.f32 %v2125_v22, 0.0 }
 0x1ca   : > { %v2259_v61 = vadd.f32 %v2258_v13, %v2228_v47  ;;  %v2229_v50 = vmax.f32 %v2117_v9, 0.0 }
 0x1cc   : > { %v2260_v31 = vadd.f32 %v2259_v61, %v2229_v50 }
 0x1ce   : > { %v2261_v7 = vadd.f32 %v2260_v31, %v2230_v51 }
 0x1d0   : > { %v2262_v43 = vadd.f32 %v2261_v7, %v2231_v55 }
 0x1e4   : > { %v2626_v52 = vpop.f32.mrb[8].mxu0 }
 0x1e5   : > { %v2129_v53 = vpop.f32.mrb[9].mxu0  ;;  %v2138_v26 = vadd.f32 %v2626_v52, %v4448_v20 }
 0x1e6   : > { %v2130_v38 = vadd.f32 %v4448_v20, %v2129_v53  ;;  %v2627_v49 = vpop.f32.mrb[10].mxu0 }
 0x1e7   : > { %v2132_v25 = vpop.f32.mrb[11].mxu0  ;;  %v2141_v23 = vadd.f32 %v2627_v49, %v4448_v20  ;;  %v2234_v41 = vmax.f32 %v2138_v26, 0.0 }
 0x1e8   : > { %v2232_v54 = vmax.f32 %v2130_v38, 0.0  ;;  %v2133_v58 = vadd.f32 %v4448_v20, %v2132_v25 }
 0x1e9   : > { %v2235_v33 = vmax.f32 %v2141_v23, 0.0 }
 0x1ea   : > { %v2263_v59 = vadd.f32 %v2262_v43, %v2232_v54  ;;  %v2233_v14 = vmax.f32 %v2133_v58, 0.0 }
 0x1ec   : > { %v2264_v27 = vadd.f32 %v2263_v59, %v2233_v14 }
 0x1ee   : > { %v2265_v62 = vadd.f32 %v2264_v27, %v2234_v41 }
 0x1f0   : > { %v2266_v2 = vadd.f32 %v2265_v62, %v2235_v33 }
 0x204   : > { %v2630_v60 = vpop.f32.mrb[12].mxu0 }
 0x205   : > { %v2145_v4 = vpop.f32.mrb[13].mxu0  ;;  %v2154_v45 = vadd.f32 %v2630_v60, %v4448_v20 }
 0x206   : > { %v2146_v5 = vadd.f32 %v4448_v20, %v2145_v4  ;;  %v2631_v30 = vpop.f32.mrb[14].mxu0 }
 0x207   : > { %v2148_v56 = vpop.f32.mrb[15].mxu0  ;;  %v2157_v11 = vadd.f32 %v2631_v30, %v4448_v20  ;;  %v2238_v63 = vmax.f32 %v2154_v45, 0.0 }
 0x208   : > { %v2236_v44 = vmax.f32 %v2146_v5, 0.0  ;;  %v2149_v42 = vadd.f32 %v4448_v20, %v2148_v56 }
 0x209   : > { %v2239_v17 = vmax.f32 %v2157_v11, 0.0 }
 0x20a   : > { %v2267_v46 = vadd.f32 %v2266_v2, %v2236_v44  ;;  %v2237_v12 = vmax.f32 %v2149_v42, 0.0 }
 0x20c   : > { %v2268_v57 = vadd.f32 %v2267_v46, %v2237_v12 }
 0x20e   : > { %v2269_v19 = vadd.f32 %v2268_v57, %v2238_v63 }
 0x210   : > { %v2270_v18 = vadd.f32 %v2269_v19, %v2239_v17 }
 0x224   : > { %v2634_v8 = vpop.f32.mrb[16].mxu0 }
 0x225   : > { %v2161_v32 = vpop.f32.mrb[17].mxu0  ;;  %v2170_v13 = vadd.f32 %v2634_v8, %v4448_v20 }
 0x226   : > { %v2162_v28 = vadd.f32 %v4448_v20, %v2161_v32  ;;  %v2635_v35 = vpop.f32.mrb[18].mxu0 }
 0x227   : > { %v2164_v29 = vpop.f32.mrb[19].mxu0  ;;  %v2173_v37 = vadd.f32 %v2635_v35, %v4448_v20  ;;  %v2242_v34 = vmax.f32 %v2170_v13, 0.0 }
 0x228   : > { %v2240_v24 = vmax.f32 %v2162_v28, 0.0  ;;  %v2165_v36 = vadd.f32 %v4448_v20, %v2164_v29 }
 0x229   : > { %v2243_v9 = vmax.f32 %v2173_v37, 0.0 }
 0x22a   : > { %v2271_v6 = vadd.f32 %v2270_v18, %v2240_v24  ;;  %v2241_v40 = vmax.f32 %v2165_v36, 0.0 }
 0x22c   : > { %v2272_v47 = vadd.f32 %v2271_v6, %v2241_v40 }
 0x22e   : > { %v2273_v0 = vadd.f32 %v2272_v47, %v2242_v34 }
 0x230   : > { %v2274_v61 = vadd.f32 %v2273_v0, %v2243_v9 }
 0x244   : > { %v2638_v22 = vpop.f32.mrb[20].mxu0 }
 0x245   : > { %v2177_v50 = vpop.f32.mrb[21].mxu0  ;;  %v2186_v7 = vadd.f32 %v2638_v22, %v4448_v20 }
 0x246   : > { %v2178_v51 = vadd.f32 %v4448_v20, %v2177_v50  ;;  %v2639_v31 = vpop.f32.mrb[22].mxu0 }
 0x247   : > { %v2180_v55 = vpop.f32.mrb[23].mxu0  ;;  %v2189_v38 = vadd.f32 %v2639_v31, %v4448_v20  ;;  %v2246_v25 = vmax.f32 %v2186_v7, 0.0 }
 0x248   : > { %v2244_v43 = vmax.f32 %v2178_v51, 0.0  ;;  %v2181_v52 = vadd.f32 %v4448_v20, %v2180_v55 }
 0x249   : > { %v2247_v54 = vmax.f32 %v2189_v38, 0.0 }
 0x24a   : > { %v2275_v53 = vadd.f32 %v2274_v61, %v2244_v43  ;;  %v2245_v49 = vmax.f32 %v2181_v52, 0.0 }
 0x24c   : > { %v2276_v26 = vadd.f32 %v2275_v53, %v2245_v49 }
 0x24e   : > { %v2277_v58 = vadd.f32 %v2276_v26, %v2246_v25 }
 0x250   : > { %v2278_v59 = vadd.f32 %v2277_v58, %v2247_v54 }
 0x264   : > { %v2642_v23 = vpop.f32.mrb[24].mxu0 }
 0x265   : > { %v2193_v14 = vpop.f32.mrb[25].mxu0  ;;  %v2202_v62 = vadd.f32 %v2642_v23, %v4448_v20 }
 0x266   : > { %v2194_v41 = vadd.f32 %v4448_v20, %v2193_v14  ;;  %v2643_v27 = vpop.f32.mrb[26].mxu0 }
 0x267   : > { %v2196_v33 = vpop.f32.mrb[27].mxu0  ;;  %v2205_v60 = vadd.f32 %v2643_v27, %v4448_v20  ;;  %v2250_v5 = vmax.f32 %v2202_v62, 0.0 }
 0x268   : > { %v2248_v39 = vmax.f32 %v2194_v41, 0.0  ;;  %v2197_v2 = vadd.f32 %v4448_v20, %v2196_v33 }
 0x269   : > { %v2251_v1 = vmax.f32 %v2205_v60, 0.0 }
 0x26a   : > { %v2279_v3 = vadd.f32 %v2278_v59, %v2248_v39  ;;  %v2249_v4 = vmax.f32 %v2197_v2, 0.0 }
 0x26c   : > { %v2280_v30 = vadd.f32 %v2279_v3, %v2249_v4 }
 0x26e   : > { %v2281_v56 = vadd.f32 %v2280_v30, %v2250_v5 }
 0x270   : > { %v2282_v45 = vadd.f32 %v2281_v56, %v2251_v1 }
 0x281   : > { %v2646_v44 = vpop.f32.mrb[28].mxu0 }
 0x282   : > { %v2209_v42 = vpop.f32.mrb[29].mxu0  ;;  %v2218_v10 = vadd.f32 %v2646_v44, %v4448_v20 }
 0x283   : > { %v2210_v46 = vadd.f32 %v4448_v20, %v2209_v42  ;;  %v2647_v11 = vpop.f32.mrb[30].mxu0 }
 0x284   : > { %v2212_v12 = vpop.f32.mrb[31].mxu0  ;;  %v2221_v19 = vadd.f32 %v2647_v11, %v4448_v20  ;;  %v2254_v18 = vmax.f32 %v2218_v10, 0.0 }
 0x285   : > { %v2252_v63 = vmax.f32 %v2210_v46, 0.0  ;;  %v2213_v57 = vadd.f32 %v4448_v20, %v2212_v12  ;;  %v2311_v20 = vld [vmem:[%s4585_s4] sm:$0x1] }
 0x286   : > { %v2255_v48 = vmax.f32 %v2221_v19, 0.0 }
 0x287   : > { %v2283_v17 = vadd.f32 %v2282_v45, %v2252_v63  ;;  %v2253_v16 = vmax.f32 %v2213_v57, 0.0 }
 0x289   : > { %v2284_v21 = vadd.f32 %v2283_v17, %v2253_v16 }
 0x28b   : > { %v2285_v15 = vadd.f32 %v2284_v21, %v2254_v18 }
 0x28d   : > { %v2286_v8 = vadd.f32 %v2285_v15, %v2255_v48 }
 0x28f   : > { %v2287_v32 = vrot.slane %v2286_v8, 4 }
 0x291   : > { %v2288_v28 = vadd.f32 %v2287_v32, %v2286_v8 }
 0x293   : > { %v2289_v35 = vrot.slane %v2288_v28, 2 }
 0x295   : > { %v2290_v29 = vadd.f32 %v2289_v35, %v2288_v28 }
 0x297   : > { %v2291_v13 = vrot.slane %v2290_v29, 1 }
 0x299   : > { %v2292_v24 = vadd.f32 %v2291_v13, %v2290_v29 }
 0x29b   : > { %v2293_v36 = vmul.f32 0.00390625, %v2292_v24 }
 0x29d   : > { %v2294_v6 = vpack.c.bf16 %v2293_v36, %v2293_v36 }
 0x29f   : > { %2665 = vmatmul.mubr.bf16.vlgmr.msra.gmra.mrb[0].mxu1 %v2294_v6 }
 0x372   : > { %v2394_v37 = vpop.f32.mrb[0].mxu1 }
 0x373   : > { %v2395_v40 = vadd.f32 %v2394_v37, %v2311_v20  ;;  %v2666_v34 = vpop.f32.mrb[1].mxu1 }
 0x374   : > { %v2397_v47 = vpop.f32.mrb[2].mxu1 }
 0x375   : > { %2400 = vst [vmem:[%s216_s12] sm:$0x1] %v2395_v40  ;;  %v2667_v9 = vpop.f32.mrb[3].mxu1 }
 0x376   : > { %3384 = shalt.err (!%p3381_p3)
}
 0x377   : > { %s3385_s30 = scalar_lea.hbm %s4539_s16, 16  ;;  %s3389_s8 = scalar_lea.hbm %s4586_s5, 32 }
 0x378   : > { %p3386_p4 = scmp.ne.s32.totalorder %s4539_s16, %s3385_s30  ;;  %p3390_p9 = scmp.lt.u32.totalorder %s4539_s16, %s4586_s5 }
 0x379   : > { %p3391_p10 = scmp.lt.u32.totalorder %s3389_s8, %s3385_s30  ;;  %p3393_p12 = scmp.lt.u32.totalorder %s3385_s30, %s4539_s16 }
 0x37a   : > { %p3387_p7 = pnand %p3386_p4, %p3515_p5 }
 0x37b   : > { %p3392_p11 = por %p3391_p10, %p3390_p9 }
 0x37c   : > { %p3388_p8 = pneg %p3387_p7 }
 0x37d   : > { %p3394_p13 = por %p3393_p12, %p3392_p11 }
 0x37f   : > { %p3395_p0 = pnand %p3394_p13, %p3388_p8 }
 0x381   : > { %3398 = shalt.err (!%p3395_p0)
}
 0x382   : > { %2668 = dma.vmem_to_hbm [thread:$0]  (%p3515_p5), %s4541_s13, 16, %s4539_s16, %s2402_s17  }
 0x383 PF: > { %p2674_p1 = scmp.ge.s32.totalorder %s3433_s21, 2  ;;  %s2426_s11 = sand.u32 1, %s3421_s18  }
 0x384   : > { %s2427_s12 = scalar_lea.sflag [#allocation4], %s2426_s11 }
 0x385   : > { %p2671_p2 = pnand %p2674_p1, %p3519_p6 }
 0x387   : > { %3416 = dma.done.wait (!%p2671_p2), %s2427_s12, 16  }
 0x388   : > { %3418 = vsyncadd (!%p2671_p2), %s2427_s12, 4294967280  ;;  %p15_p3 = scmp.ge.s32.totalorder %s3502_s24, 4   ;;  %s4589_s18 = smov %s3425_s19 }
 0x389   : > { %s4590_s19 = smov %s3429_s20  ;;  %s4591_s20 = smov %s3513_s27 }
 0x38a   : > { %s4592_s21 = smov %s3502_s24  ;;  %17 = sbr.rel (!%p15_p3) target bundleno = 3 (0x3), region = 77 }
 0x391   :  { %2431 = vsyncpa [#allocation4], 1 }
 0x392   :  { %2433 = vsyncpa [#allocation4 + $0x1], 1 }

</bundles_post_ra>
